<compile_context>
chip_gen: v5e
topology: v5e:2x2
jax: 0.10.0
libtpu: 0.0.40
codegen_flags: <defaults>
</compile_context>

<pallas_src>
import functools
import math

import jax
import jax.numpy as jnp
from jax import lax
from jax.experimental import pallas as pl
from jax.experimental.pallas import tpu as pltpu

EPS = 1e-5


# ----------------------------- Pallas kernel ---------------------------------


def _conv_block_kernel(*refs, Ho, Wo, stride, relu, res_mode):
    """Fused 3x3 conv (+folded-BN bias) [+ residual | + fused 1x1 downsample
    conv] [+ ReLU] for one batch image and one output-channel tile.

    refs (in order):
      x_ref   : (3, stride, Hs, Wo, Cin)   pre-shifted / padded activation (bf16)
      w_ref   : (9, Cin, tn)               folded conv weights (bf16)
      b_ref   : (1, tn)                    folded BN bias (f32)
      [r_ref  : (Ho, Wo, tn)]              residual           (res_mode == "add")
      [xs_ref : (Ho, Wo, Cds)]             strided block input (res_mode == "ds")
      [wds_ref: (Cds, tn)]                 folded 1x1 downsample weights
      [bds_ref: (1, tn)]                   folded downsample BN bias
      o_ref   : (Ho, Wo, tn)               output tile (bf16)
    """
    x_ref, w_ref, b_ref = refs[0], refs[1], refs[2]
    o_ref = refs[-1]
    cin = x_ref.shape[-1]

    # 9-tap reduction; f32 accumulator initialized by the first tap's matmul
    # (no zeroed scratch, no read-modify-write of a VMEM accumulator).
    acc = None
    for t in range(9):
        i, j = t // 3, t % 3
        oi = i // stride
        xt = x_ref[j, i % stride, oi:oi + Ho, :, :].reshape(Ho * Wo, cin)
        d = jnp.dot(xt, w_ref[t], preferred_element_type=jnp.float32)
        acc = d if acc is None else acc + d
    acc = acc + b_ref[...]

    if res_mode == "ds":
        # Fused 1x1 downsample conv + BN on the identity path.
        xs_ref, wds_ref, bds_ref = refs[3], refs[4], refs[5]
        xs = xs_ref[...].reshape(Ho * Wo, xs_ref.shape[-1])
        acc = acc + (jnp.dot(xs, wds_ref[...], preferred_element_type=jnp.float32)
                     + bds_ref[...])
    elif res_mode == "add":
        # Plain identity residual.
        acc = acc + refs[3][...].reshape(Ho * Wo, -1).astype(jnp.float32)

    if relu:
        acc = jnp.maximum(acc, 0.0)
    o_ref[...] = acc.reshape(Ho, Wo, -1).astype(o_ref.dtype)


# ------------------------------ host-side glue --------------------------------


def fold_bn(w, gamma, beta, mean, var):
    """Fold inference-mode BN into the conv weights: epilogue is just `+ bias`."""
    scale = gamma / jnp.sqrt(var + EPS)            # (oc,)
    return w * scale, beta - mean * scale          # scale broadcasts over last dim


def _prep_conv_input(x_nhwc, stride):
    """Spatial pad=1, pre-apply the 3 kw shifts (including the conv's W-stride)
    and split the H parity, so every in-kernel tap window is a plain slice
    along untiled dims only:

        slab(i, j) = prep[b, j, i % stride, i//stride : i//stride + Ho, :, :]

    One ~3x-activation repack pass instead of the 9x im2col patches write+read.
    Returns prep of shape (B, 3, stride, Hs, Wo, C) plus (Ho, Wo).
    """
    B, H, W, C = x_nhwc.shape
    assert stride in (1, 2) and H % stride == 0 and W % stride == 0
    Ho, Wo = H // stride, W // stride
    xp = jnp.pad(x_nhwc, ((0, 0), (1, 1), (1, 1), (0, 0)))
    xw = jnp.stack([xp[:, :, j:j + stride * (Wo - 1) + 1:stride, :]
                    for j in range(3)], axis=1)                 # (B, 3, H+2, Wo, C)
    xs = jnp.stack([xw[:, :, hi::stride, :, :]
                    for hi in range(stride)], axis=2)           # (B, 3, stride, Hs, Wo, C)
    return xs, Ho, Wo


def _pick_tn(cout_p, batch):
    """Output-channel tile: largest of (512, 256, 128) dividing cout_p, then
    split further if needed so the parallel grid has >= 2 blocks (v7x: 2 TCs)."""
    tn = cout_p
    for cand in (512, 256, 128):
        if cout_p % cand == 0:
            tn = cand
            break
    while batch * (cout_p // tn) < 2 and tn > 128 and tn % 256 == 0:
        tn //= 2
    return tn


def conv3x3_bn(x_nhwc, w_hwio, bn, *, stride, relu=True,
               residual=None, downsample=None, out_dtype=jnp.bfloat16):
    """3x3 conv (pad=1) + folded BN + optional fused residual path + ReLU as a
    single pallas_call.

    downsample = (xs, w_ds, b_ds): 1x1 strided conv (already BN-folded) applied
                 to xs and added before the ReLU (fused into the epilogue).
    residual   = NHWC tensor added before the ReLU.
    """
    B, H, W, Cin = x_nhwc.shape
    kh, kw, wcin, Cout = w_hwio.shape
    assert (kh, kw) == (3, 3) and wcin == Cin
    assert residual is None or downsample is None

    w_f, bias = fold_bn(w_hwio, *bn)
    w_taps = w_f.reshape(9, Cin, Cout).astype(jnp.bfloat16)
    b_row = bias.reshape(1, Cout).astype(jnp.float32)

    # Lane-dense stores: pad output channels to a multiple of 128.
    cout_p = -(-Cout // 128) * 128
    pad_c = cout_p - Cout
    if pad_c:
        w_taps = jnp.pad(w_taps, ((0, 0), (0, 0), (0, pad_c)))
        b_row = jnp.pad(b_row, ((0, 0), (0, pad_c)))

    planes, Ho, Wo = _prep_conv_input(x_nhwc.astype(jnp.bfloat16), stride)
    assert Wo % 8 == 0, "output width must be a multiple of the 8-row sublane tile"
    _, _, s_dim, Hs, _, _ = planes.shape

    tn = _pick_tn(cout_p, B)
    grid = (B, cout_p // tn)

    in_specs = [
        pl.BlockSpec((None, 3, s_dim, Hs, Wo, Cin),
                     lambda b, j: (b, 0, 0, 0, 0, 0)),
        pl.BlockSpec((9, Cin, tn), lambda b, j: (0, 0, j)),
        pl.BlockSpec((1, tn), lambda b, j: (0, j)),
    ]
    args = [planes, w_taps, b_row]

    if downsample is not None:
        xs, w_ds, b_ds = downsample
        cds = xs.shape[-1]
        assert xs.shape == (B, Ho, Wo, cds)
        w_ds = w_ds.astype(jnp.bfloat16)
        b_ds = b_ds.reshape(1, Cout).astype(jnp.float32)
        if pad_c:
            w_ds = jnp.pad(w_ds, ((0, 0), (0, pad_c)))
            b_ds = jnp.pad(b_ds, ((0, 0), (0, pad_c)))
        in_specs += [
            pl.BlockSpec((None, Ho, Wo, cds), lambda b, j: (b, 0, 0, 0)),
            pl.BlockSpec((cds, tn), lambda b, j: (0, j)),
            pl.BlockSpec((1, tn), lambda b, j: (0, j)),
        ]
        args += [xs.astype(jnp.bfloat16), w_ds, b_ds]
        res_mode = "ds"
    elif residual is not None:
        assert residual.shape == (B, Ho, Wo, Cout)
        r = residual.astype(jnp.bfloat16)
        if pad_c:
            r = jnp.pad(r, ((0, 0), (0, 0), (0, 0), (0, pad_c)))
        in_specs.append(pl.BlockSpec((None, Ho, Wo, tn), lambda b, j: (b, 0, 0, j)))
        args.append(r)
        res_mode = "add"
    else:
        res_mode = "none"

    out_spec = pl.BlockSpec((None, Ho, Wo, tn), lambda b, j: (b, 0, 0, j))

    # VMEM budget from the double-buffered block footprint, capped for v7x
    # (64 MiB physical VMEM per TensorCore -> stay <= 48 MiB).
    def _nbytes(shape, dt):
        return math.prod(shape) * jnp.dtype(dt).itemsize

    blk = (_nbytes((3, s_dim, Hs, Wo, Cin), jnp.bfloat16)
           + _nbytes((9, Cin, tn), jnp.bfloat16)
           + _nbytes((1, tn), jnp.float32)
           + _nbytes((Ho, Wo, tn), jnp.bfloat16))
    if downsample is not None:
        blk += (_nbytes((Ho, Wo, cds), jnp.bfloat16)
                + _nbytes((cds, tn), jnp.bfloat16)
                + _nbytes((1, tn), jnp.float32))
    elif residual is not None:
        blk += _nbytes((Ho, Wo, tn), jnp.bfloat16)
    vmem_limit = int(min(48 * 2 ** 20, max(4 * blk, 32 * 2 ** 20)))

    kernel = functools.partial(_conv_block_kernel, Ho=Ho, Wo=Wo, stride=stride,
                               relu=relu, res_mode=res_mode)

    y = pl.pallas_call(
        kernel,
        out_shape=jax.ShapeDtypeStruct((B, Ho, Wo, cout_p), out_dtype),
        grid=grid,
        in_specs=in_specs,
        out_specs=out_spec,
        compiler_params=pltpu.CompilerParams(
            dimension_semantics=("parallel", "parallel"),
            vmem_limit_bytes=vmem_limit,
        ),
    )(*args)

    if pad_c:
        y = y[..., :Cout]
    return y


# ------------------------------ BasicBlock ------------------------------------


def basic_block_forward(params, x_nchw, stride):
    """BasicBlock forward: conv1+bn1+relu, then conv2+bn2(+downsample)+add+relu.
    NCHW at the boundary (PyTorch semantics), NHWC/bf16 internally."""
    x = jnp.transpose(x_nchw, (0, 2, 3, 1)).astype(jnp.bfloat16)   # NCHW -> NHWC

    # conv1 + bn1 + relu  (one pallas_call; im2col fused in-kernel)
    out = conv3x3_bn(x, params["w1"], params["bn1"], stride=stride, relu=True)

    # conv2 + bn2 + residual (+ fused 1x1 downsample conv) + relu (one pallas_call)
    if "w_ds" in params:
        w_ds, b_ds = fold_bn(params["w_ds"][0, 0], *params["bn_ds"])
        xs = x[:, ::stride, ::stride, :]
        out = conv3x3_bn(out, params["w2"], params["bn2"], stride=1, relu=True,
                         downsample=(xs, w_ds, b_ds))
    else:
        out = conv3x3_bn(out, params["w2"], params["bn2"], stride=1, relu=True,
                         residual=x)

    # NHWC -> NCHW to match the PyTorch module's layout (output kept bf16; a
    # NHWC consumer could drop this transpose entirely).
    return jnp.transpose(out, (0, 3, 1, 2))


# ------------------------------ reference (f32) --------------------------------


def ref_basic_block(params, x_nchw, stride):
    x = jnp.transpose(x_nchw, (0, 2, 3, 1)).astype(jnp.float32)

    def conv(inp, w, s, p):
        return lax.conv_general_dilated(
            inp, w, (s, s), [(p, p), (p, p)],
            dimension_numbers=("NHWC", "HWIO", "NHWC"))

    def bn(y, gamma, beta, mean, var):
        return (y - mean) * (gamma / jnp.sqrt(var + EPS)) + beta

    out = jax.nn.relu(bn(conv(x, params["w1"], stride, 1), *params["bn1"]))
    out = bn(conv(out, params["w2"], 1, 1), *params["bn2"])
    if "w_ds" in params:
        identity = bn(conv(x, params["w_ds"], stride, 0), *params["bn_ds"])
    else:
        identity = x
    out = jax.nn.relu(out + identity)
    return jnp.transpose(out, (0, 3, 1, 2))


# ------------------------------ parameters -------------------------------------


def make_params(key, in_ch, out_ch, stride):
    keys = jax.random.split(key, 6)

    def conv_w(k, kh, kw, ic, oc):
        fan_out = oc * kh * kw
        return jax.random.normal(k, (kh, kw, ic, oc), jnp.float32) * math.sqrt(2.0 / fan_out)

    def bn_p(k, c):
        k1, k2, k3 = jax.random.split(k, 3)
        gamma = 1.0 + 0.1 * jax.random.normal(k1, (c,), jnp.float32)
        beta = 0.1 * jax.random.normal(k2, (c,), jnp.float32)
        mean = 0.1 * jax.random.normal(k3, (c,), jnp.float32)
        var = jnp.ones((c,), jnp.float32)
        return (gamma, beta, mean, var)

    p = {
        "w1": conv_w(keys[0], 3, 3, in_ch, out_ch), "bn1": bn_p(keys[1], out_ch),
        "w2": conv_w(keys[2], 3, 3, out_ch, out_ch), "bn2": bn_p(keys[3], out_ch),
    }
    if stride != 1 or in_ch != out_ch:
        p["w_ds"] = conv_w(keys[4], 1, 1, in_ch, out_ch)
        p["bn_ds"] = bn_p(keys[5], out_ch)
    return p


# --------------------------------- main ----------------------------------------


if __name__ == "__main__":
    key = jax.random.PRNGKey(0)

    def run_case(name, k, B, Cin, H, W, Cout, stride):
        k_x, k_p = jax.random.split(k)
        x = jax.random.normal(k_x, (B, Cin, H, W), jnp.float32)
        params = make_params(k_p, Cin, Cout, stride)

        fwd = jax.jit(functools.partial(basic_block_forward, stride=stride))
        out = jax.block_until_ready(fwd(params, x))
        assert out.shape == (B, Cout, H // stride, W // stride), (name, out.shape)

        ref = ref_basic_block(params, x, stride)
        err = float(jnp.max(jnp.abs(out.astype(jnp.float32) - ref)))
        assert err < 0.25, f"{name}: max abs error vs f32 reference: {err}"
        return err

    k1, k2 = jax.random.split(key)
    # Downsample path (stride-2, 64 -> 128 channels): exercises the fused
    # 1x1-downsample residual epilogue.
    run_case("downsample", k1, B=2, Cin=64, H=16, W=16, Cout=128, stride=2)
    # Identity path (stride-1, 64 -> 64 channels): exercises the plain residual
    # add and the output-channel padding to 128 lanes.
    run_case("identity", k2, B=2, Cin=64, H=16, W=16, Cout=64, stride=1)

    print("KERNEL_OK")
</pallas_src>

<mosaic_0001>
module attributes {stable_mosaic.version = 11 : i64} {
  func.func @_conv_block_kernel(%arg0: i32, %arg1: i32, %arg2: memref<1x3x2x9x8x64xbf16, #tpu.memory_space<vmem>>, %arg3: memref<9x64x128xbf16, #tpu.memory_space<vmem>>, %arg4: memref<1x128xf32, #tpu.memory_space<vmem>>, %arg5: memref<1x8x8x128xbf16, #tpu.memory_space<vmem>>) attributes {dimension_semantics = [#tpu.dimension_semantics<parallel>, #tpu.dimension_semantics<parallel>], iteration_bounds = array<i64: 2, 1>, scalar_prefetch = 0 : i64, scratch_operands = 0 : i64, tpu.core_type = #tpu.core_type<tc>, window_params = [{transform_indices = @transform_0, window_bounds = array<i64: 1, 3, 2, 9, 8, 64>}, {transform_indices = @transform_1, window_bounds = array<i64: 9, 64, 128>}, {transform_indices = @transform_2, window_bounds = array<i64: 1, 128>}, {transform_indices = @transform_3, window_bounds = array<i64: 1, 8, 8, 128>}]} {
    %c0 = arith.constant 0 : index
    %c0_0 = arith.constant 0 : index
    %c0_1 = arith.constant 0 : index
    %c0_2 = arith.constant 0 : index
    %c0_3 = arith.constant 0 : index
    %c0_4 = arith.constant 0 : index
    %0 = vector.load %arg2[%c0, %c0_0, %c0_1, %c0_2, %c0_3, %c0_4] : memref<1x3x2x9x8x64xbf16, #tpu.memory_space<vmem>>, vector<1x1x1x8x8x64xbf16>
    %1 = vector.shape_cast %0 : vector<1x1x1x8x8x64xbf16> to vector<8x8x64xbf16>
    %2 = vector.shape_cast %1 : vector<8x8x64xbf16> to vector<64x64xbf16>
    %c0_5 = arith.constant 0 : index
    %c0_6 = arith.constant 0 : index
    %c0_7 = arith.constant 0 : index
    %3 = vector.load %arg3[%c0_5, %c0_6, %c0_7] : memref<9x64x128xbf16, #tpu.memory_space<vmem>>, vector<1x64x128xbf16>
    %4 = vector.shape_cast %3 : vector<1x64x128xbf16> to vector<64x128xbf16>
    %cst = arith.constant dense<0.000000e+00> : vector<64x128xf32>
    %5 = tpu.matmul %2, %4, %cst {dimension_numbers = #tpu.dot_dimension_numbers<[1], [0], [0], [1], [0, 0, 1, 1], [], []>} : vector<64x64xbf16>, vector<64x128xbf16>, vector<64x128xf32> -> vector<64x128xf32>
    %c0_8 = arith.constant 0 : index
    %c1 = arith.constant 1 : index
    %c0_9 = arith.constant 0 : index
    %c0_10 = arith.constant 0 : index
    %c0_11 = arith.constant 0 : index
    %c0_12 = arith.constant 0 : index
    %6 = vector.load %arg2[%c0_8, %c1, %c0_9, %c0_10, %c0_11, %c0_12] : memref<1x3x2x9x8x64xbf16, #tpu.memory_space<vmem>>, vector<1x1x1x8x8x64xbf16>
    %7 = vector.shape_cast %6 : vector<1x1x1x8x8x64xbf16> to vector<8x8x64xbf16>
    %8 = vector.shape_cast %7 : vector<8x8x64xbf16> to vector<64x64xbf16>
    %c1_13 = arith.constant 1 : index
    %c0_14 = arith.constant 0 : index
    %c0_15 = arith.constant 0 : index
    %9 = vector.load %arg3[%c1_13, %c0_14, %c0_15] : memref<9x64x128xbf16, #tpu.memory_space<vmem>>, vector<1x64x128xbf16>
    %10 = vector.shape_cast %9 : vector<1x64x128xbf16> to vector<64x128xbf16>
    %cst_16 = arith.constant dense<0.000000e+00> : vector<64x128xf32>
    %11 = tpu.matmul %8, %10, %cst_16 {dimension_numbers = #tpu.dot_dimension_numbers<[1], [0], [0], [1], [0, 0, 1, 1], [], []>} : vector<64x64xbf16>, vector<64x128xbf16>, vector<64x128xf32> -> vector<64x128xf32>
    %12 = arith.addf %5, %11 : vector<64x128xf32>
    %c0_17 = arith.constant 0 : index
    %c2 = arith.constant 2 : index
    %c0_18 = arith.constant 0 : index
    %c0_19 = arith.constant 0 : index
    %c0_20 = arith.constant 0 : index
    %c0_21 = arith.constant 0 : index
    %13 = vector.load %arg2[%c0_17, %c2, %c0_18, %c0_19, %c0_20, %c0_21] : memref<1x3x2x9x8x64xbf16, #tpu.memory_space<vmem>>, vector<1x1x1x8x8x64xbf16>
    %14 = vector.shape_cast %13 : vector<1x1x1x8x8x64xbf16> to vector<8x8x64xbf16>
    %15 = vector.shape_cast %14 : vector<8x8x64xbf16> to vector<64x64xbf16>
    %c2_22 = arith.constant 2 : index
    %c0_23 = arith.constant 0 : index
    %c0_24 = arith.constant 0 : index
    %16 = vector.load %arg3[%c2_22, %c0_23, %c0_24] : memref<9x64x128xbf16, #tpu.memory_space<vmem>>, vector<1x64x128xbf16>
    %17 = vector.shape_cast %16 : vector<1x64x128xbf16> to vector<64x128xbf16>
    %cst_25 = arith.constant dense<0.000000e+00> : vector<64x128xf32>
    %18 = tpu.matmul %15, %17, %cst_25 {dimension_numbers = #tpu.dot_dimension_numbers<[1], [0], [0], [1], [0, 0, 1, 1], [], []>} : vector<64x64xbf16>, vector<64x128xbf16>, vector<64x128xf32> -> vector<64x128xf32>
    %19 = arith.addf %12, %18 : vector<64x128xf32>
    %c0_26 = arith.constant 0 : index
    %c0_27 = arith.constant 0 : index
    %c1_28 = arith.constant 1 : index
    %c0_29 = arith.constant 0 : index
    %c0_30 = arith.constant 0 : index
    %c0_31 = arith.constant 0 : index
    %20 = vector.load %arg2[%c0_26, %c0_27, %c1_28, %c0_29, %c0_30, %c0_31] : memref<1x3x2x9x8x64xbf16, #tpu.memory_space<vmem>>, vector<1x1x1x8x8x64xbf16>
    %21 = vector.shape_cast %20 : vector<1x1x1x8x8x64xbf16> to vector<8x8x64xbf16>
    %22 = vector.shape_cast %21 : vector<8x8x64xbf16> to vector<64x64xbf16>
    %c3 = arith.constant 3 : index
    %c0_32 = arith.constant 0 : index
    %c0_33 = arith.constant 0 : index
    %23 = vector.load %arg3[%c3, %c0_32, %c0_33] : memref<9x64x128xbf16, #tpu.memory_space<vmem>>, vector<1x64x128xbf16>
    %24 = vector.shape_cast %23 : vector<1x64x128xbf16> to vector<64x128xbf16>
    %cst_34 = arith.constant dense<0.000000e+00> : vector<64x128xf32>
    %25 = tpu.matmul %22, %24, %cst_34 {dimension_numbers = #tpu.dot_dimension_numbers<[1], [0], [0], [1], [0, 0, 1, 1], [], []>} : vector<64x64xbf16>, vector<64x128xbf16>, vector<64x128xf32> -> vector<64x128xf32>
    %26 = arith.addf %19, %25 : vector<64x128xf32>
    %c0_35 = arith.constant 0 : index
    %c1_36 = arith.constant 1 : index
    %c1_37 = arith.constant 1 : index
    %c0_38 = arith.constant 0 : index
    %c0_39 = arith.constant 0 : index
    %c0_40 = arith.constant 0 : index
    %27 = vector.load %arg2[%c0_35, %c1_36, %c1_37, %c0_38, %c0_39, %c0_40] : memref<1x3x2x9x8x64xbf16, #tpu.memory_space<vmem>>, vector<1x1x1x8x8x64xbf16>
    %28 = vector.shape_cast %27 : vector<1x1x1x8x8x64xbf16> to vector<8x8x64xbf16>
    %29 = vector.shape_cast %28 : vector<8x8x64xbf16> to vector<64x64xbf16>
    %c4 = arith.constant 4 : index
    %c0_41 = arith.constant 0 : index
    %c0_42 = arith.constant 0 : index
    %30 = vector.load %arg3[%c4, %c0_41, %c0_42] : memref<9x64x128xbf16, #tpu.memory_space<vmem>>, vector<1x64x128xbf16>
    %31 = vector.shape_cast %30 : vector<1x64x128xbf16> to vector<64x128xbf16>
    %cst_43 = arith.constant dense<0.000000e+00> : vector<64x128xf32>
    %32 = tpu.matmul %29, %31, %cst_43 {dimension_numbers = #tpu.dot_dimension_numbers<[1], [0], [0], [1], [0, 0, 1, 1], [], []>} : vector<64x64xbf16>, vector<64x128xbf16>, vector<64x128xf32> -> vector<64x128xf32>
    %33 = arith.addf %26, %32 : vector<64x128xf32>
    %c0_44 = arith.constant 0 : index
    %c2_45 = arith.constant 2 : index
    %c1_46 = arith.constant 1 : index
    %c0_47 = arith.constant 0 : index
    %c0_48 = arith.constant 0 : index
    %c0_49 = arith.constant 0 : index
    %34 = vector.load %arg2[%c0_44, %c2_45, %c1_46, %c0_47, %c0_48, %c0_49] : memref<1x3x2x9x8x64xbf16, #tpu.memory_space<vmem>>, vector<1x1x1x8x8x64xbf16>
    %35 = vector.shape_cast %34 : vector<1x1x1x8x8x64xbf16> to vector<8x8x64xbf16>
    %36 = vector.shape_cast %35 : vector<8x8x64xbf16> to vector<64x64xbf16>
    %c5 = arith.constant 5 : index
    %c0_50 = arith.constant 0 : index
    %c0_51 = arith.constant 0 : index
    %37 = vector.load %arg3[%c5, %c0_50, %c0_51] : memref<9x64x128xbf16, #tpu.memory_space<vmem>>, vector<1x64x128xbf16>
    %38 = vector.shape_cast %37 : vector<1x64x128xbf16> to vector<64x128xbf16>
    %cst_52 = arith.constant dense<0.000000e+00> : vector<64x128xf32>
    %39 = tpu.matmul %36, %38, %cst_52 {dimension_numbers = #tpu.dot_dimension_numbers<[1], [0], [0], [1], [0, 0, 1, 1], [], []>} : vector<64x64xbf16>, vector<64x128xbf16>, vector<64x128xf32> -> vector<64x128xf32>
    %40 = arith.addf %33, %39 : vector<64x128xf32>
    %c0_53 = arith.constant 0 : index
    %c0_54 = arith.constant 0 : index
    %c0_55 = arith.constant 0 : index
    %c1_56 = arith.constant 1 : index
    %c0_57 = arith.constant 0 : index
    %c0_58 = arith.constant 0 : index
    %41 = vector.load %arg2[%c0_53, %c0_54, %c0_55, %c1_56, %c0_57, %c0_58] : memref<1x3x2x9x8x64xbf16, #tpu.memory_space<vmem>>, vector<1x1x1x8x8x64xbf16>
    %42 = vector.shape_cast %41 : vector<1x1x1x8x8x64xbf16> to vector<8x8x64xbf16>
    %43 = vector.shape_cast %42 : vector<8x8x64xbf16> to vector<64x64xbf16>
    %c6 = arith.constant 6 : index
    %c0_59 = arith.constant 0 : index
    %c0_60 = arith.constant 0 : index
    %44 = vector.load %arg3[%c6, %c0_59, %c0_60] : memref<9x64x128xbf16, #tpu.memory_space<vmem>>, vector<1x64x128xbf16>
    %45 = vector.shape_cast %44 : vector<1x64x128xbf16> to vector<64x128xbf16>
    %cst_61 = arith.constant dense<0.000000e+00> : vector<64x128xf32>
    %46 = tpu.matmul %43, %45, %cst_61 {dimension_numbers = #tpu.dot_dimension_numbers<[1], [0], [0], [1], [0, 0, 1, 1], [], []>} : vector<64x64xbf16>, vector<64x128xbf16>, vector<64x128xf32> -> vector<64x128xf32>
    %47 = arith.addf %40, %46 : vector<64x128xf32>
    %c0_62 = arith.constant 0 : index
    %c1_63 = arith.constant 1 : index
    %c0_64 = arith.constant 0 : index
    %c1_65 = arith.constant 1 : index
    %c0_66 = arith.constant 0 : index
    %c0_67 = arith.constant 0 : index
    %48 = vector.load %arg2[%c0_62, %c1_63, %c0_64, %c1_65, %c0_66, %c0_67] : memref<1x3x2x9x8x64xbf16, #tpu.memory_space<vmem>>, vector<1x1x1x8x8x64xbf16>
    %49 = vector.shape_cast %48 : vector<1x1x1x8x8x64xbf16> to vector<8x8x64xbf16>
    %50 = vector.shape_cast %49 : vector<8x8x64xbf16> to vector<64x64xbf16>
    %c7 = arith.constant 7 : index
    %c0_68 = arith.constant 0 : index
    %c0_69 = arith.constant 0 : index
    %51 = vector.load %arg3[%c7, %c0_68, %c0_69] : memref<9x64x128xbf16, #tpu.memory_space<vmem>>, vector<1x64x128xbf16>
    %52 = vector.shape_cast %51 : vector<1x64x128xbf16> to vector<64x128xbf16>
    %cst_70 = arith.constant dense<0.000000e+00> : vector<64x128xf32>
    %53 = tpu.matmul %50, %52, %cst_70 {dimension_numbers = #tpu.dot_dimension_numbers<[1], [0], [0], [1], [0, 0, 1, 1], [], []>} : vector<64x64xbf16>, vector<64x128xbf16>, vector<64x128xf32> -> vector<64x128xf32>
    %54 = arith.addf %47, %53 : vector<64x128xf32>
    %c0_71 = arith.constant 0 : index
    %c2_72 = arith.constant 2 : index
    %c0_73 = arith.constant 0 : index
    %c1_74 = arith.constant 1 : index
    %c0_75 = arith.constant 0 : index
    %c0_76 = arith.constant 0 : index
    %55 = vector.load %arg2[%c0_71, %c2_72, %c0_73, %c1_74, %c0_75, %c0_76] : memref<1x3x2x9x8x64xbf16, #tpu.memory_space<vmem>>, vector<1x1x1x8x8x64xbf16>
    %56 = vector.shape_cast %55 : vector<1x1x1x8x8x64xbf16> to vector<8x8x64xbf16>
    %57 = vector.shape_cast %56 : vector<8x8x64xbf16> to vector<64x64xbf16>
    %c8 = arith.constant 8 : index
    %c0_77 = arith.constant 0 : index
    %c0_78 = arith.constant 0 : index
    %58 = vector.load %arg3[%c8, %c0_77, %c0_78] : memref<9x64x128xbf16, #tpu.memory_space<vmem>>, vector<1x64x128xbf16>
    %59 = vector.shape_cast %58 : vector<1x64x128xbf16> to vector<64x128xbf16>
    %cst_79 = arith.constant dense<0.000000e+00> : vector<64x128xf32>
    %60 = tpu.matmul %57, %59, %cst_79 {dimension_numbers = #tpu.dot_dimension_numbers<[1], [0], [0], [1], [0, 0, 1, 1], [], []>} : vector<64x64xbf16>, vector<64x128xbf16>, vector<64x128xf32> -> vector<64x128xf32>
    %61 = arith.addf %54, %60 : vector<64x128xf32>
    %c0_80 = arith.constant 0 : index
    %c0_81 = arith.constant 0 : index
    %62 = vector.load %arg4[%c0_80, %c0_81] : memref<1x128xf32, #tpu.memory_space<vmem>>, vector<1x128xf32>
    %63 = vector.broadcast %62 : vector<1x128xf32> to vector<64x128xf32>
    %64 = arith.addf %61, %63 : vector<64x128xf32>
    %cst_82 = arith.constant 0.000000e+00 : f32
    %65 = vector.broadcast %cst_82 : f32 to vector<64x128xf32>
    %66 = arith.maximumf %64, %65 : vector<64x128xf32>
    %67 = vector.shape_cast %66 : vector<64x128xf32> to vector<8x8x128xf32>
    %68 = arith.truncf %67 : vector<8x8x128xf32> to vector<8x8x128xbf16>
    %c0_83 = arith.constant 0 : index
    %c0_84 = arith.constant 0 : index
    %c0_85 = arith.constant 0 : index
    %c0_86 = arith.constant 0 : index
    %69 = vector.load %arg5[%c0_83, %c0_84, %c0_85, %c0_86] : memref<1x8x8x128xbf16, #tpu.memory_space<vmem>>, vector<1x8x8x128xbf16>
    %70 = vector.shape_cast %69 : vector<1x8x8x128xbf16> to vector<8x8x128xbf16>
    %71 = vector.shape_cast %68 : vector<8x8x128xbf16> to vector<1x8x8x128xbf16>
    tpu.vector_store %arg5[%c0_83, %c0_84, %c0_85, %c0_86], %71 {strides = array<i32>} : memref<1x8x8x128xbf16, #tpu.memory_space<vmem>>, vector<1x8x8x128xbf16>,
    return
  }
  func.func @transform_0(%arg0: i32, %arg1: i32) -> (i32, i32, i32, i32, i32, i32) {
    %c0_i32 = arith.constant 0 : i32
    %c0_i32_0 = arith.constant 0 : i32
    %c0_i32_1 = arith.constant 0 : i32
    %c0_i32_2 = arith.constant 0 : i32
    %c0_i32_3 = arith.constant 0 : i32
    %c0_i32_4 = arith.constant 0 : i32
    return %arg0, %c0_i32, %c0_i32_0, %c0_i32_1, %c0_i32_2, %c0_i32_3 : i32, i32, i32, i32, i32, i32
  }
  func.func @transform_1(%arg0: i32, %arg1: i32) -> (i32, i32, i32) {
    %c0_i32 = arith.constant 0 : i32
    %c0_i32_0 = arith.constant 0 : i32
    %c0_i32_1 = arith.constant 0 : i32
    return %c0_i32, %c0_i32_0, %arg1 : i32, i32, i32
  }
  func.func @transform_2(%arg0: i32, %arg1: i32) -> (i32, i32) {
    %c0_i32 = arith.constant 0 : i32
    %c0_i32_0 = arith.constant 0 : i32
    return %c0_i32, %arg1 : i32, i32
  }
  func.func @transform_3(%arg0: i32, %arg1: i32) -> (i32, i32, i32, i32) {
    %c0_i32 = arith.constant 0 : i32
    %c0_i32_0 = arith.constant 0 : i32
    %c0_i32_1 = arith.constant 0 : i32
    return %arg0, %c0_i32, %c0_i32_0, %arg1 : i32, i32, i32, i32
  }
}

module attributes {stable_mosaic.version = 11 : i64} {
  func.func @_conv_block_kernel(%arg0: i32, %arg1: i32, %arg2: memref<1x3x1x10x8x128xbf16, #tpu.memory_space<vmem>>, %arg3: memref<9x128x128xbf16, #tpu.memory_space<vmem>>, %arg4: memref<1x128xf32, #tpu.memory_space<vmem>>, %arg5: memref<1x8x8x64xbf16, #tpu.memory_space<vmem>>, %arg6: memref<64x128xbf16, #tpu.memory_space<vmem>>, %arg7: memref<1x128xf32, #tpu.memory_space<vmem>>, %arg8: memref<1x8x8x128xbf16, #tpu.memory_space<vmem>>) attributes {dimension_semantics = [#tpu.dimension_semantics<parallel>, #tpu.dimension_semantics<parallel>], iteration_bounds = array<i64: 2, 1>, scalar_prefetch = 0 : i64, scratch_operands = 0 : i64, tpu.core_type = #tpu.core_type<tc>, window_params = [{transform_indices = @transform_0, window_bounds = array<i64: 1, 3, 1, 10, 8, 128>}, {transform_indices = @transform_1, window_bounds = array<i64: 9, 128, 128>}, {transform_indices = @transform_2, window_bounds = array<i64: 1, 128>}, {transform_indices = @transform_3, window_bounds = array<i64: 1, 8, 8, 64>}, {transform_indices = @transform_4, window_bounds = array<i64: 64, 128>}, {transform_indices = @transform_5, window_bounds = array<i64: 1, 128>}, {transform_indices = @transform_6, window_bounds = array<i64: 1, 8, 8, 128>}]} {
    %c0 = arith.constant 0 : index
    %c0_0 = arith.constant 0 : index
    %c0_1 = arith.constant 0 : index
    %c0_2 = arith.constant 0 : index
    %c0_3 = arith.constant 0 : index
    %c0_4 = arith.constant 0 : index
    %0 = vector.load %arg2[%c0, %c0_0, %c0_1, %c0_2, %c0_3, %c0_4] : memref<1x3x1x10x8x128xbf16, #tpu.memory_space<vmem>>, vector<1x1x1x8x8x128xbf16>
    %1 = vector.shape_cast %0 : vector<1x1x1x8x8x128xbf16> to vector<8x8x128xbf16>
    %2 = vector.shape_cast %1 : vector<8x8x128xbf16> to vector<64x128xbf16>
    %c0_5 = arith.constant 0 : index
    %c0_6 = arith.constant 0 : index
    %c0_7 = arith.constant 0 : index
    %3 = vector.load %arg3[%c0_5, %c0_6, %c0_7] : memref<9x128x128xbf16, #tpu.memory_space<vmem>>, vector<1x128x128xbf16>
    %4 = vector.shape_cast %3 : vector<1x128x128xbf16> to vector<128x128xbf16>
    %cst = arith.constant dense<0.000000e+00> : vector<64x128xf32>
    %5 = tpu.matmul %2, %4, %cst {dimension_numbers = #tpu.dot_dimension_numbers<[1], [0], [0], [1], [0, 0, 1, 1], [], []>} : vector<64x128xbf16>, vector<128x128xbf16>, vector<64x128xf32> -> vector<64x128xf32>
    %c0_8 = arith.constant 0 : index
    %c1 = arith.constant 1 : index
    %c0_9 = arith.constant 0 : index
    %c0_10 = arith.constant 0 : index
    %c0_11 = arith.constant 0 : index
    %c0_12 = arith.constant 0 : index
    %6 = vector.load %arg2[%c0_8, %c1, %c0_9, %c0_10, %c0_11, %c0_12] : memref<1x3x1x10x8x128xbf16, #tpu.memory_space<vmem>>, vector<1x1x1x8x8x128xbf16>
    %7 = vector.shape_cast %6 : vector<1x1x1x8x8x128xbf16> to vector<8x8x128xbf16>
    %8 = vector.shape_cast %7 : vector<8x8x128xbf16> to vector<64x128xbf16>
    %c1_13 = arith.constant 1 : index
    %c0_14 = arith.constant 0 : index
    %c0_15 = arith.constant 0 : index
    %9 = vector.load %arg3[%c1_13, %c0_14, %c0_15] : memref<9x128x128xbf16, #tpu.memory_space<vmem>>, vector<1x128x128xbf16>
    %10 = vector.shape_cast %9 : vector<1x128x128xbf16> to vector<128x128xbf16>
    %cst_16 = arith.constant dense<0.000000e+00> : vector<64x128xf32>
    %11 = tpu.matmul %8, %10, %cst_16 {dimension_numbers = #tpu.dot_dimension_numbers<[1], [0], [0], [1], [0, 0, 1, 1], [], []>} : vector<64x128xbf16>, vector<128x128xbf16>, vector<64x128xf32> -> vector<64x128xf32>
    %12 = arith.addf %5, %11 : vector<64x128xf32>
    %c0_17 = arith.constant 0 : index
    %c2 = arith.constant 2 : index
    %c0_18 = arith.constant 0 : index
    %c0_19 = arith.constant 0 : index
    %c0_20 = arith.constant 0 : index
    %c0_21 = arith.constant 0 : index
    %13 = vector.load %arg2[%c0_17, %c2, %c0_18, %c0_19, %c0_20, %c0_21] : memref<1x3x1x10x8x128xbf16, #tpu.memory_space<vmem>>, vector<1x1x1x8x8x128xbf16>
    %14 = vector.shape_cast %13 : vector<1x1x1x8x8x128xbf16> to vector<8x8x128xbf16>
    %15 = vector.shape_cast %14 : vector<8x8x128xbf16> to vector<64x128xbf16>
    %c2_22 = arith.constant 2 : index
    %c0_23 = arith.constant 0 : index
    %c0_24 = arith.constant 0 : index
    %16 = vector.load %arg3[%c2_22, %c0_23, %c0_24] : memref<9x128x128xbf16, #tpu.memory_space<vmem>>, vector<1x128x128xbf16>
    %17 = vector.shape_cast %16 : vector<1x128x128xbf16> to vector<128x128xbf16>
    %cst_25 = arith.constant dense<0.000000e+00> : vector<64x128xf32>
    %18 = tpu.matmul %15, %17, %cst_25 {dimension_numbers = #tpu.dot_dimension_numbers<[1], [0], [0], [1], [0, 0, 1, 1], [], []>} : vector<64x128xbf16>, vector<128x128xbf16>, vector<64x128xf32> -> vector<64x128xf32>
    %19 = arith.addf %12, %18 : vector<64x128xf32>
    %c0_26 = arith.constant 0 : index
    %c0_27 = arith.constant 0 : index
    %c0_28 = arith.constant 0 : index
    %c1_29 = arith.constant 1 : index
    %c0_30 = arith.constant 0 : index
    %c0_31 = arith.constant 0 : index
    %20 = vector.load %arg2[%c0_26, %c0_27, %c0_28, %c1_29, %c0_30, %c0_31] : memref<1x3x1x10x8x128xbf16, #tpu.memory_space<vmem>>, vector<1x1x1x8x8x128xbf16>
    %21 = vector.shape_cast %20 : vector<1x1x1x8x8x128xbf16> to vector<8x8x128xbf16>
    %22 = vector.shape_cast %21 : vector<8x8x128xbf16> to vector<64x128xbf16>
    %c3 = arith.constant 3 : index
    %c0_32 = arith.constant 0 : index
    %c0_33 = arith.constant 0 : index
    %23 = vector.load %arg3[%c3, %c0_32, %c0_33] : memref<9x128x128xbf16, #tpu.memory_space<vmem>>, vector<1x128x128xbf16>
    %24 = vector.shape_cast %23 : vector<1x128x128xbf16> to vector<128x128xbf16>
    %cst_34 = arith.constant dense<0.000000e+00> : vector<64x128xf32>
    %25 = tpu.matmul %22, %24, %cst_34 {dimension_numbers = #tpu.dot_dimension_numbers<[1], [0], [0], [1], [0, 0, 1, 1], [], []>} : vector<64x128xbf16>, vector<128x128xbf16>, vector<64x128xf32> -> vector<64x128xf32>
    %26 = arith.addf %19, %25 : vector<64x128xf32>
    %c0_35 = arith.constant 0 : index
    %c1_36 = arith.constant 1 : index
    %c0_37 = arith.constant 0 : index
    %c1_38 = arith.constant 1 : index
    %c0_39 = arith.constant 0 : index
    %c0_40 = arith.constant 0 : index
    %27 = vector.load %arg2[%c0_35, %c1_36, %c0_37, %c1_38, %c0_39, %c0_40] : memref<1x3x1x10x8x128xbf16, #tpu.memory_space<vmem>>, vector<1x1x1x8x8x128xbf16>
    %28 = vector.shape_cast %27 : vector<1x1x1x8x8x128xbf16> to vector<8x8x128xbf16>
    %29 = vector.shape_cast %28 : vector<8x8x128xbf16> to vector<64x128xbf16>
    %c4 = arith.constant 4 : index
    %c0_41 = arith.constant 0 : index
    %c0_42 = arith.constant 0 : index
    %30 = vector.load %arg3[%c4, %c0_41, %c0_42] : memref<9x128x128xbf16, #tpu.memory_space<vmem>>, vector<1x128x128xbf16>
    %31 = vector.shape_cast %30 : vector<1x128x128xbf16> to vector<128x128xbf16>
    %cst_43 = arith.constant dense<0.000000e+00> : vector<64x128xf32>
    %32 = tpu.matmul %29, %31, %cst_43 {dimension_numbers = #tpu.dot_dimension_numbers<[1], [0], [0], [1], [0, 0, 1, 1], [], []>} : vector<64x128xbf16>, vector<128x128xbf16>, vector<64x128xf32> -> vector<64x128xf32>
    %33 = arith.addf %26, %32 : vector<64x128xf32>
    %c0_44 = arith.constant 0 : index
    %c2_45 = arith.constant 2 : index
    %c0_46 = arith.constant 0 : index
    %c1_47 = arith.constant 1 : index
    %c0_48 = arith.constant 0 : index
    %c0_49 = arith.constant 0 : index
    %34 = vector.load %arg2[%c0_44, %c2_45, %c0_46, %c1_47, %c0_48, %c0_49] : memref<1x3x1x10x8x128xbf16, #tpu.memory_space<vmem>>, vector<1x1x1x8x8x128xbf16>
    %35 = vector.shape_cast %34 : vector<1x1x1x8x8x128xbf16> to vector<8x8x128xbf16>
    %36 = vector.shape_cast %35 : vector<8x8x128xbf16> to vector<64x128xbf16>
    %c5 = arith.constant 5 : index
    %c0_50 = arith.constant 0 : index
    %c0_51 = arith.constant 0 : index
    %37 = vector.load %arg3[%c5, %c0_50, %c0_51] : memref<9x128x128xbf16, #tpu.memory_space<vmem>>, vector<1x128x128xbf16>
    %38 = vector.shape_cast %37 : vector<1x128x128xbf16> to vector<128x128xbf16>
    %cst_52 = arith.constant dense<0.000000e+00> : vector<64x128xf32>
    %39 = tpu.matmul %36, %38, %cst_52 {dimension_numbers = #tpu.dot_dimension_numbers<[1], [0], [0], [1], [0, 0, 1, 1], [], []>} : vector<64x128xbf16>, vector<128x128xbf16>, vector<64x128xf32> -> vector<64x128xf32>
    %40 = arith.addf %33, %39 : vector<64x128xf32>
    %c0_53 = arith.constant 0 : index
    %c0_54 = arith.constant 0 : index
    %c0_55 = arith.constant 0 : index
    %c2_56 = arith.constant 2 : index
    %c0_57 = arith.constant 0 : index
    %c0_58 = arith.constant 0 : index
    %41 = vector.load %arg2[%c0_53, %c0_54, %c0_55, %c2_56, %c0_57, %c0_58] : memref<1x3x1x10x8x128xbf16, #tpu.memory_space<vmem>>, vector<1x1x1x8x8x128xbf16>
    %42 = vector.shape_cast %41 : vector<1x1x1x8x8x128xbf16> to vector<8x8x128xbf16>
    %43 = vector.shape_cast %42 : vector<8x8x128xbf16> to vector<64x128xbf16>
    %c6 = arith.constant 6 : index
    %c0_59 = arith.constant 0 : index
    %c0_60 = arith.constant 0 : index
    %44 = vector.load %arg3[%c6, %c0_59, %c0_60] : memref<9x128x128xbf16, #tpu.memory_space<vmem>>, vector<1x128x128xbf16>
    %45 = vector.shape_cast %44 : vector<1x128x128xbf16> to vector<128x128xbf16>
    %cst_61 = arith.constant dense<0.000000e+00> : vector<64x128xf32>
    %46 = tpu.matmul %43, %45, %cst_61 {dimension_numbers = #tpu.dot_dimension_numbers<[1], [0], [0], [1], [0, 0, 1, 1], [], []>} : vector<64x128xbf16>, vector<128x128xbf16>, vector<64x128xf32> -> vector<64x128xf32>
    %47 = arith.addf %40, %46 : vector<64x128xf32>
    %c0_62 = arith.constant 0 : index
    %c1_63 = arith.constant 1 : index
    %c0_64 = arith.constant 0 : index
    %c2_65 = arith.constant 2 : index
    %c0_66 = arith.constant 0 : index
    %c0_67 = arith.constant 0 : index
    %48 = vector.load %arg2[%c0_62, %c1_63, %c0_64, %c2_65, %c0_66, %c0_67] : memref<1x3x1x10x8x128xbf16, #tpu.memory_space<vmem>>, vector<1x1x1x8x8x128xbf16>
    %49 = vector.shape_cast %48 : vector<1x1x1x8x8x128xbf16> to vector<8x8x128xbf16>
    %50 = vector.shape_cast %49 : vector<8x8x128xbf16> to vector<64x128xbf16>
    %c7 = arith.constant 7 : index
    %c0_68 = arith.constant 0 : index
    %c0_69 = arith.constant 0 : index
    %51 = vector.load %arg3[%c7, %c0_68, %c0_69] : memref<9x128x128xbf16, #tpu.memory_space<vmem>>, vector<1x128x128xbf16>
    %52 = vector.shape_cast %51 : vector<1x128x128xbf16> to vector<128x128xbf16>
    %cst_70 = arith.constant dense<0.000000e+00> : vector<64x128xf32>
    %53 = tpu.matmul %50, %52, %cst_70 {dimension_numbers = #tpu.dot_dimension_numbers<[1], [0], [0], [1], [0, 0, 1, 1], [], []>} : vector<64x128xbf16>, vector<128x128xbf16>, vector<64x128xf32> -> vector<64x128xf32>
    %54 = arith.addf %47, %53 : vector<64x128xf32>
    %c0_71 = arith.constant 0 : index
    %c2_72 = arith.constant 2 : index
    %c0_73 = arith.constant 0 : index
    %c2_74 = arith.constant 2 : index
    %c0_75 = arith.constant 0 : index
    %c0_76 = arith.constant 0 : index
    %55 = vector.load %arg2[%c0_71, %c2_72, %c0_73, %c2_74, %c0_75, %c0_76] : memref<1x3x1x10x8x128xbf16, #tpu.memory_space<vmem>>, vector<1x1x1x8x8x128xbf16>
    %56 = vector.shape_cast %55 : vector<1x1x1x8x8x128xbf16> to vector<8x8x128xbf16>
    %57 = vector.shape_cast %56 : vector<8x8x128xbf16> to vector<64x128xbf16>
    %c8 = arith.constant 8 : index
    %c0_77 = arith.constant 0 : index
    %c0_78 = arith.constant 0 : index
    %58 = vector.load %arg3[%c8, %c0_77, %c0_78] : memref<9x128x128xbf16, #tpu.memory_space<vmem>>, vector<1x128x128xbf16>
    %59 = vector.shape_cast %58 : vector<1x128x128xbf16> to vector<128x128xbf16>
    %cst_79 = arith.constant dense<0.000000e+00> : vector<64x128xf32>
    %60 = tpu.matmul %57, %59, %cst_79 {dimension_numbers = #tpu.dot_dimension_numbers<[1], [0], [0], [1], [0, 0, 1, 1], [], []>} : vector<64x128xbf16>, vector<128x128xbf16>, vector<64x128xf32> -> vector<64x128xf32>
    %61 = arith.addf %54, %60 : vector<64x128xf32>
    %c0_80 = arith.constant 0 : index
    %c0_81 = arith.constant 0 : index
    %62 = vector.load %arg4[%c0_80, %c0_81] : memref<1x128xf32, #tpu.memory_space<vmem>>, vector<1x128xf32>
    %63 = vector.broadcast %62 : vector<1x128xf32> to vector<64x128xf32>
    %64 = arith.addf %61, %63 : vector<64x128xf32>
    %c0_82 = arith.constant 0 : index
    %c0_83 = arith.constant 0 : index
    %c0_84 = arith.constant 0 : index
    %c0_85 = arith.constant 0 : index
    %65 = vector.load %arg5[%c0_82, %c0_83, %c0_84, %c0_85] : memref<1x8x8x64xbf16, #tpu.memory_space<vmem>>, vector<1x8x8x64xbf16>
    %66 = vector.shape_cast %65 : vector<1x8x8x64xbf16> to vector<8x8x64xbf16>
    %67 = vector.shape_cast %66 : vector<8x8x64xbf16> to vector<64x64xbf16>
    %c0_86 = arith.constant 0 : index
    %c0_87 = arith.constant 0 : index
    %68 = vector.load %arg6[%c0_86, %c0_87] : memref<64x128xbf16, #tpu.memory_space<vmem>>, vector<64x128xbf16>
    %cst_88 = arith.constant dense<0.000000e+00> : vector<64x128xf32>
    %69 = tpu.matmul %67, %68, %cst_88 {dimension_numbers = #tpu.dot_dimension_numbers<[1], [0], [0], [1], [0, 0, 1, 1], [], []>} : vector<64x64xbf16>, vector<64x128xbf16>, vector<64x128xf32> -> vector<64x128xf32>
    %c0_89 = arith.constant 0 : index
    %c0_90 = arith.constant 0 : index
    %70 = vector.load %arg7[%c0_89, %c0_90] : memref<1x128xf32, #tpu.memory_space<vmem>>, vector<1x128xf32>
    %71 = vector.broadcast %70 : vector<1x128xf32> to vector<64x128xf32>
    %72 = arith.addf %69, %71 : vector<64x128xf32>
    %73 = arith.addf %64, %72 : vector<64x128xf32>
    %cst_91 = arith.constant 0.000000e+00 : f32
    %74 = vector.broadcast %cst_91 : f32 to vector<64x128xf32>
    %75 = arith.maximumf %73, %74 : vector<64x128xf32>
    %76 = vector.shape_cast %75 : vector<64x128xf32> to vector<8x8x128xf32>
    %77 = arith.truncf %76 : vector<8x8x128xf32> to vector<8x8x128xbf16>
    %c0_92 = arith.constant 0 : index
    %c0_93 = arith.constant 0 : index
    %c0_94 = arith.constant 0 : index
    %c0_95 = arith.constant 0 : index
    %78 = vector.load %arg8[%c0_92, %c0_93, %c0_94, %c0_95] : memref<1x8x8x128xbf16, #tpu.memory_space<vmem>>, vector<1x8x8x128xbf16>
    %79 = vector.shape_cast %78 : vector<1x8x8x128xbf16> to vector<8x8x128xbf16>
    %80 = vector.shape_cast %77 : vector<8x8x128xbf16> to vector<1x8x8x128xbf16>
    tpu.vector_store %arg8[%c0_92, %c0_93, %c0_94, %c0_95], %80 {strides = array<i32>} : memref<1x8x8x128xbf16, #tpu.memory_space<vmem>>, vector<1x8x8x128xbf16>,
    return
  }
  func.func @transform_0(%arg0: i32, %arg1: i32) -> (i32, i32, i32, i32, i32, i32) {
    %c0_i32 = arith.constant 0 : i32
    %c0_i32_0 = arith.constant 0 : i32
    %c0_i32_1 = arith.constant 0 : i32
    %c0_i32_2 = arith.constant 0 : i32
    %c0_i32_3 = arith.constant 0 : i32
    %c0_i32_4 = arith.constant 0 : i32
    return %arg0, %c0_i32, %c0_i32_0, %c0_i32_1, %c0_i32_2, %c0_i32_3 : i32, i32, i32, i32, i32, i32
  }
  func.func @transform_1(%arg0: i32, %arg1: i32) -> (i32, i32, i32) {
    %c0_i32 = arith.constant 0 : i32
    %c0_i32_0 = arith.constant 0 : i32
    %c0_i32_1 = arith.constant 0 : i32
    return %c0_i32, %c0_i32_0, %arg1 : i32, i32, i32
  }
  func.func @transform_2(%arg0: i32, %arg1: i32) -> (i32, i32) {
    %c0_i32 = arith.constant 0 : i32
    %c0_i32_0 = arith.constant 0 : i32
    return %c0_i32, %arg1 : i32, i32
  }
  func.func @transform_3(%arg0: i32, %arg1: i32) -> (i32, i32, i32, i32) {
    %c0_i32 = arith.constant 0 : i32
    %c0_i32_0 = arith.constant 0 : i32
    %c0_i32_1 = arith.constant 0 : i32
    %c0_i32_2 = arith.constant 0 : i32
    return %arg0, %c0_i32, %c0_i32_0, %c0_i32_1 : i32, i32, i32, i32
  }
  func.func @transform_4(%arg0: i32, %arg1: i32) -> (i32, i32) {
    %c0_i32 = arith.constant 0 : i32
    %c0_i32_0 = arith.constant 0 : i32
    return %c0_i32, %arg1 : i32, i32
  }
  func.func @transform_5(%arg0: i32, %arg1: i32) -> (i32, i32) {
    %c0_i32 = arith.constant 0 : i32
    %c0_i32_0 = arith.constant 0 : i32
    return %c0_i32, %arg1 : i32, i32
  }
  func.func @transform_6(%arg0: i32, %arg1: i32) -> (i32, i32, i32, i32) {
    %c0_i32 = arith.constant 0 : i32
    %c0_i32_0 = arith.constant 0 : i32
    %c0_i32_1 = arith.constant 0 : i32
    return %arg0, %c0_i32, %c0_i32_0, %arg1 : i32, i32, i32, i32
  }
}

</mosaic_0001>

<bundles_post_ra>
// kernel: basic_block_forward.2
= control target key start
LH: loop header
LB: loop body
LE: loop exit
PB: predicated region body
PF: predicated region fallthrough
CT: control target
= control target key end

     0   :  { %s1988_s12 = smov 0   ;;  %s1990_s13 = smov 0   ;;  %s2268_s0 = inlined_call_operand.vmem [shape: bf16[2,3,2,9,8,64], index: 0, kind: input, shape index: {}]   ;;  %s2269_s1 = inlined_call_operand.vmem [shape: bf16[9,64,128], index: 1, kind: input, shape index: {}]   ;;  %s2270_s2 = inlined_call_operand.vmem [shape: f32[1,128], index: 2, kind: input, shape index: {}]   ;;  %s2271_s3 = inlined_call_operand.vmem [shape: bf16[2,8,8,128], index: 3, kind: output, shape index: {}]  }
   0x1   :  { %s1992_s14 = smov 0  }
   0x2 LB: > { %s25_s15 = sadd.s32 1, %s1962_s13  ;;  %p1352_p0 = scmp.ge.s32.totalorder %s1966_s14, 1  ;;  %s1966_s14 = sphi %s1992_s14, %s13_s14   ;;  %s1962_s13 = sphi %s1990_s13, %s2273_s13   ;;  %s1958_s12 = sphi %s1988_s12, %s2272_s12  }
   0x3   : > { %p27_p1 = scmp.ge.s32.totalorder %s25_s15, 2  ;;  %p168_p2 = scmp.lt.s32.totalorder %s1966_s14, 3 }
   0x5   : > { %s2275_s15 = smov (%p27_p1, %s25_s15), 0  ;;  %p169_p3 = pnand %p1352_p0, %p168_p2 }
   0x6   : > { %p202_p4 = scmp.lt.s32.totalorder (!%p169_p3), %s1958_s12, 1 }
   0x7   : > { %172 = sbr.rel (%p169_p3) target bundleno = 309 (0x135), region = 32 }
   0xc   : > { %v1826_v0 = vld [vmem:[%s2269_s1 + $0x38] sm:$0xff]  ;;  %v1825_v1 = vld [vmem:[%s2269_s1 + $0x30] sm:$0xff]  ;;  %s2277_s12 = smov (!%p202_p4, %s1958_s12), 1  ;;  %v1824_v2 = vld [vmem:[%s2269_s1 + $0x28] sm:$0xff]  ;;  %vm301_vm0 = vcmask 523264  }
   0xd   : > { %1906 = vmatpush.bf16.msra.mxu1 %v1826_v0  ;;  %1907 = vmatpush.bf16.msra.mxu2 %v1826_v0  ;;  %s1918_s22 = smul.u32 216, %s2277_s12  ;;  %v1823_v3 = vld [vmem:[%s2269_s1 + $0x20] sm:$0xff]  ;;  %v1834_v4 = vld [vmem:[%s2269_s1 + $0x58] sm:$0xff]  ;;  %v1833_v12 = vld [vmem:[%s2269_s1 + $0x50] sm:$0xff]  ;;  %s1810_s26 = sshll.u32 %s2277_s12, 5 }
   0xe   : > { %1908 = vmatpush.bf16.msra.mxu3 %v1826_v0  ;;  %318 = vmatpush.bf16.msra.mxu0 %v1826_v0  ;;  %v1818_v5 = vld [vmem:[%s2269_s1 + $0x18] sm:$0xff]  ;;  %v1817_v13 = vld [vmem:[%s2269_s1 + $0x10] sm:$0xff]  ;;  %v1832_v16 = vld [vmem:[%s2269_s1 + $0x48] sm:$0xff]  ;;  %s2234_s30 = scalar_lea.vmem %s2271_s3, %s1810_s26 }
   0xf   : > { %s2024_s27 = scalar_lea.vmem %s2268_s0, %s1918_s22  ;;  %v1842_v10 = vld [vmem:[%s2269_s1 + $0x78] sm:$0xff]  ;;  %v1841_v14 = vld [vmem:[%s2269_s1 + $0x70] sm:$0xff]  ;;  %v1816_v17 = vld [vmem:[%s2269_s1 + $0x8] sm:$0xff] }
  0x10   : > { %v1820_v6 = vld [vmem:[%s2024_s27 + $0x50] sm:$0xff]  ;;  %v1821_v7 = vld [vmem:[%s2024_s27 + $0x58] sm:$0xff]  ;;  %v1822_v8 = vld [vmem:[%s2024_s27 + $0x60] sm:$0xff] }
  0x11   : > { %1909 = vmatpush.bf16.msra.mxu1 %v1825_v1  ;;  %1910 = vmatpush.bf16.msra.mxu2 %v1825_v1  ;;  %v1819_v9 = vld [vmem:[%s2024_s27 + $0x48] sm:$0xff]  ;;  %v1850_v11 = vld [vmem:[%s2269_s1 + $0x98] sm:$0xff]  ;;  %v1849_v15 = vld [vmem:[%s2269_s1 + $0x90] sm:$0xff] }
  0x12   : > { %1911 = vmatpush.bf16.msra.mxu3 %v1825_v1  ;;  %319 = vmatpush.bf16.msra.mxu0 %v1825_v1  ;;  %v1840_v18 = vld [vmem:[%s2269_s1 + $0x68] sm:$0xff]  ;;  %v1831_v20 = vld [vmem:[%s2269_s1 + $0x40] sm:$0xff]  ;;  %v1866_v22 = vld [vmem:[%s2269_s1 + $0xd8] sm:$0xff] }
  0x13   : > { %v1848_v19 = vld [vmem:[%s2269_s1 + $0x88] sm:$0xff]  ;;  %v1815_v21 = vld [vmem:[%s2269_s1] sm:$0xff]  ;;  %v1858_v23 = vld [vmem:[%s2269_s1 + $0xb8] sm:$0xff] }
  0x14   : > { %v1839_v24 = vld [vmem:[%s2269_s1 + $0x60] sm:$0xff]  ;;  %v1874_v26 = vld [vmem:[%s2269_s1 + $0xf8] sm:$0xff]  ;;  %v1827_v29 = vld [vmem:[%s2024_s27 + $0x90] sm:$0xff] }
  0x15   : > { %1912 = vmatpush.bf16.msra.mxu1 %v1824_v2  ;;  %1913 = vmatpush.bf16.msra.mxu2 %v1824_v2  ;;  %v1847_v25 = vld [vmem:[%s2269_s1 + $0x80] sm:$0xff]  ;;  %v1882_v27 = vld [vmem:[%s2269_s1 + $0x118] sm:$0xff]  ;;  %v1843_v31 = vld [vmem:[%s2024_s27 + $0x6c] sm:$0xff] }
  0x16   : > { %1914 = vmatpush.bf16.msra.mxu3 %v1824_v2  ;;  %320 = vmatpush.bf16.msra.mxu0 %v1824_v2  ;;  %v1811_v28 = vld [vmem:[%s2024_s27] sm:$0xff]  ;;  %v1865_v32 = vld [vmem:[%s2269_s1 + $0xd0] sm:$0xff]  ;;  %v1864_v36 = vld [vmem:[%s2269_s1 + $0xc8] sm:$0xff] }
  0x17   : > { %v1835_v30 = vld [vmem:[%s2024_s27 + $0x24] sm:$0xff]  ;;  %v1857_v33 = vld [vmem:[%s2269_s1 + $0xb0] sm:$0xff]  ;;  %v1828_v41 = vld [vmem:[%s2024_s27 + $0x98] sm:$0xff] }
  0x18   : > { %v1873_v34 = vld [vmem:[%s2269_s1 + $0xf0] sm:$0xff]  ;;  %v1856_v37 = vld [vmem:[%s2269_s1 + $0xa8] sm:$0xff]  ;;  %v1863_v44 = vld [vmem:[%s2269_s1 + $0xc0] sm:$0xff] }
  0x19   : > { %1915 = vmatpush.bf16.msra.mxu1 %v1823_v3  ;;  %1916 = vmatpush.bf16.msra.mxu2 %v1823_v3  ;;  %v1881_v35 = vld [vmem:[%s2269_s1 + $0x110] sm:$0xff]  ;;  %v1872_v38 = vld [vmem:[%s2269_s1 + $0xe8] sm:$0xff]  ;;  %v1871_v45 = vld [vmem:[%s2269_s1 + $0xe0] sm:$0xff] }
  0x1a   : > { %1917 = vmatpush.bf16.msra.mxu3 %v1823_v3  ;;  %321 = vmatpush.bf16.msra.mxu0 %v1823_v3  ;;  %v1880_v39 = vld [vmem:[%s2269_s1 + $0x108] sm:$0xff]  ;;  %v1844_v43 = vld [vmem:[%s2024_s27 + $0x74] sm:$0xff]  ;;  %v1855_v46 = vld [vmem:[%s2269_s1 + $0xa0] sm:$0xff] }
  0x1b   : > { %v1812_v40 = vld [vmem:[%s2024_s27 + $0x8] sm:$0xff]  ;;  %v1879_v47 = vld [vmem:[%s2269_s1 + $0x100] sm:$0xff]  ;;  %v1813_v48 = vld [vmem:[%s2024_s27 + $0x10] sm:$0xff] }
  0x1c   : > { %1405 = vmatmul.msk.bf16.vlgmr.msra.gmra.mxu1 %vm301_vm0, %v1820_v6  ;;  %1406 = vmatmul.msk.bf16.vlgmr.msra.gmra.mxu2 %vm301_vm0, %v1821_v7  ;;  %v1836_v42 = vld [vmem:[%s2024_s27 + $0x2c] sm:$0xff]  ;;  %v1829_v49 = vld [vmem:[%s2024_s27 + $0xa0] sm:$0xff]  ;;  %v1837_v50 = vld [vmem:[%s2024_s27 + $0x34] sm:$0xff] }
  0x1d   : > { %506 = vmatpush.bf16.msrb.mxu2 %v1834_v4  ;;  %403 = vmatpush.bf16.msrb.mxu1 %v1818_v5  ;;  %v1845_v51 = vld [vmem:[%s2024_s27 + $0x7c] sm:$0xff]  ;;  %v1830_v53 = vld [vmem:[%s2024_s27 + $0xa8] sm:$0xff]  ;;  %v1851_v56 = vld [vmem:[%s2024_s27 + $0xb4] sm:$0xff] }
  0x1e   : > { %1407 = vmatmul.msk.bf16.vlgmr.msra.gmra.mxu3 %vm301_vm0, %v1822_v8  ;;  %1404 = vmatmul.msk.bf16.vlgmr.msra.gmra.mxu0 %vm301_vm0, %v1819_v9  ;;  %v1814_v52 = vld [vmem:[%s2024_s27 + $0x18] sm:$0xff]  ;;  %v1846_v55 = vld [vmem:[%s2024_s27 + $0x84] sm:$0xff]  ;;  %v1867_v58 = vld [vmem:[%s2024_s27 + $0x4c] sm:$0xff] }
  0x1f   : > { %617 = vmatpush.bf16.msrb.mxu3 %v1842_v10  ;;  %728 = vmatpush.bf16.msrb.mxu0 %v1850_v11  ;;  %v1838_v54 = vld [vmem:[%s2024_s27 + $0x3c] sm:$0xff]  ;;  %v1859_v57 = vld [vmem:[%s2024_s27 + $0x4] sm:$0xff]  ;;  %v1875_v59 = vld [vmem:[%s2024_s27 + $0x94] sm:$0xff] }
  0x20   : > { %v1852_v60 = vld [vmem:[%s2024_s27 + $0xbc] sm:$0xff]  ;;  %v1860_v61 = vld [vmem:[%s2024_s27 + $0xc] sm:$0xff]  ;;  %v1868_v62 = vld [vmem:[%s2024_s27 + $0x54] sm:$0xff] }
  0x21   : > { %507 = vmatpush.bf16.msrb.mxu2 %v1833_v12  ;;  %404 = vmatpush.bf16.msrb.mxu1 %v1817_v13  ;;  %v1876_v63 = vld [vmem:[%s2024_s27 + $0x9c] sm:$0xff]  ;;  %v1853_v0 = vld [vmem:[%s2024_s27 + $0xc4] sm:$0xff]  ;;  %v1861_v1 = vld [vmem:[%s2024_s27 + $0x14] sm:$0xff] }
  0x22   : > { %v1869_v2 = vld [vmem:[%s2024_s27 + $0x5c] sm:$0xff]  ;;  %v1877_v3 = vld [vmem:[%s2024_s27 + $0xa4] sm:$0xff]  ;;  %v1854_v4 = vld [vmem:[%s2024_s27 + $0xcc] sm:$0xff] }
  0x23   : > { %618 = vmatpush.bf16.msrb.mxu3 %v1841_v14  ;;  %729 = vmatpush.bf16.msrb.mxu0 %v1849_v15  ;;  %v1862_v5 = vld [vmem:[%s2024_s27 + $0x1c] sm:$0xff]  ;;  %v1870_v7 = vld [vmem:[%s2024_s27 + $0x64] sm:$0xff]  ;;  %v1878_v8 = vld [vmem:[%s2024_s27 + $0xac] sm:$0xff] }
  0x25   : > { %508 = vmatpush.bf16.msrb.mxu2 %v1832_v16  ;;  %405 = vmatpush.bf16.msrb.mxu1 %v1816_v17 }
  0x27   : > { %619 = vmatpush.bf16.msrb.mxu3 %v1840_v18  ;;  %730 = vmatpush.bf16.msrb.mxu0 %v1848_v19 }
  0x29   : > { %509 = vmatpush.bf16.msrb.mxu2 %v1831_v20  ;;  %406 = vmatpush.bf16.msrb.mxu1 %v1815_v21 }
  0x2b   : > { %620 = vmatpush.bf16.msrb.mxu3 %v1839_v24  ;;  %731 = vmatpush.bf16.msrb.mxu0 %v1847_v25 }
  0x2c   : > { %1440 = vmatmul.msk.bf16.vlgmr.msrb.gmra.mxu1 %vm301_vm0, %v1811_v28  ;;  %1492 = vmatmul.msk.bf16.vlgmr.msrb.gmra.mxu2 %vm301_vm0, %v1827_v29 }
  0x2d   : > { %950 = vmatpush.bf16.msra.mxu2 %v1866_v22  ;;  %839 = vmatpush.bf16.msra.mxu1 %v1858_v23 }
  0x2e   : > { %1544 = vmatmul.msk.bf16.vlgmr.msrb.gmra.mxu3 %vm301_vm0, %v1835_v30  ;;  %1596 = vmatmul.msk.bf16.vlgmr.msrb.gmra.mxu0 %vm301_vm0, %v1843_v31 }
  0x2f   : > { %1061 = vmatpush.bf16.msra.mxu3 %v1874_v26  ;;  %1172 = vmatpush.bf16.msra.mxu0 %v1882_v27 }
  0x31   : > { %951 = vmatpush.bf16.msra.mxu2 %v1865_v32  ;;  %840 = vmatpush.bf16.msra.mxu1 %v1857_v33 }
  0x33   : > { %1062 = vmatpush.bf16.msra.mxu3 %v1873_v34  ;;  %1173 = vmatpush.bf16.msra.mxu0 %v1881_v35 }
  0x35   : > { %952 = vmatpush.bf16.msra.mxu2 %v1864_v36  ;;  %841 = vmatpush.bf16.msra.mxu1 %v1856_v37 }
  0x37   : > { %1063 = vmatpush.bf16.msra.mxu3 %v1872_v38  ;;  %1174 = vmatpush.bf16.msra.mxu0 %v1880_v39 }
  0x39   : > { %953 = vmatpush.bf16.msra.mxu2 %v1863_v44  ;;  %842 = vmatpush.bf16.msra.mxu1 %v1855_v46 }
  0x3b   : > { %1064 = vmatpush.bf16.msra.mxu3 %v1871_v45  ;;  %1175 = vmatpush.bf16.msra.mxu0 %v1879_v47 }
  0x3c   : > { %1441 = vmatmul.msk.bf16.gmra.mxu1 %vm301_vm0, %v1812_v40  ;;  %1493 = vmatmul.msk.bf16.gmra.mxu2 %vm301_vm0, %v1828_v41 }
  0x3e   : > { %1545 = vmatmul.msk.bf16.gmra.mxu3 %vm301_vm0, %v1836_v42  ;;  %1597 = vmatmul.msk.bf16.gmra.mxu0 %vm301_vm0, %v1844_v43 }
  0x4c   : > { %1442 = vmatmul.msk.bf16.gmra.mxu1 %vm301_vm0, %v1813_v48  ;;  %1494 = vmatmul.msk.bf16.gmra.mxu2 %vm301_vm0, %v1829_v49 }
  0x4e   : > { %1546 = vmatmul.msk.bf16.gmra.mxu3 %vm301_vm0, %v1837_v50  ;;  %1598 = vmatmul.msk.bf16.gmra.mxu0 %vm301_vm0, %v1845_v51 }
  0x5c   : > { %1443 = vmatmul.msk.bf16.gmra.mxu1 %vm301_vm0, %v1814_v52  ;;  %1495 = vmatmul.msk.bf16.gmra.mxu2 %vm301_vm0, %v1830_v53 }
  0x5e   : > { %1547 = vmatmul.msk.bf16.gmra.mxu3 %vm301_vm0, %v1838_v54  ;;  %1599 = vmatmul.msk.bf16.gmra.mxu0 %vm301_vm0, %v1846_v55 }
  0x6c   : > { %1648 = vmatmul.msk.bf16.vlgmr.msra.gmra.mxu1 %vm301_vm0, %v1851_v56  ;;  %1700 = vmatmul.msk.bf16.vlgmr.msra.gmra.mxu2 %vm301_vm0, %v1859_v57 }
  0x6e   : > { %1752 = vmatmul.msk.bf16.vlgmr.msra.gmra.mxu3 %vm301_vm0, %v1867_v58  ;;  %1804 = vmatmul.msk.bf16.vlgmr.msra.gmra.mxu0 %vm301_vm0, %v1875_v59 }
  0x7c   : > { %1649 = vmatmul.msk.bf16.gmra.mxu1 %vm301_vm0, %v1852_v60  ;;  %1701 = vmatmul.msk.bf16.gmra.mxu2 %vm301_vm0, %v1860_v61 }
  0x7e   : > { %1753 = vmatmul.msk.bf16.gmra.mxu3 %vm301_vm0, %v1868_v62  ;;  %1805 = vmatmul.msk.bf16.gmra.mxu0 %vm301_vm0, %v1876_v63 }
  0x8c   : > { %1650 = vmatmul.msk.bf16.gmra.mxu1 %vm301_vm0, %v1853_v0  ;;  %1702 = vmatmul.msk.bf16.gmra.mxu2 %vm301_vm0, %v1861_v1 }
  0x8e   : > { %1754 = vmatmul.msk.bf16.gmra.mxu3 %vm301_vm0, %v1869_v2  ;;  %1806 = vmatmul.msk.bf16.gmra.mxu0 %vm301_vm0, %v1877_v3 }
  0x99   : > { %v328_v6 = vpop.f32.mrf.mxu1 }
  0x9b   : > { %v323_v9 = vpop.f32.mrf.mxu0 }
  0x9c   : > { %1651 = vmatmul.msk.bf16.gmra.mxu1 %vm301_vm0, %v1854_v4  ;;  %1703 = vmatmul.msk.bf16.gmra.mxu2 %vm301_vm0, %v1862_v5 }
  0x9e   : > { %1755 = vmatmul.msk.bf16.gmra.mxu3 %vm301_vm0, %v1870_v7  ;;  %1807 = vmatmul.msk.bf16.gmra.mxu0 %vm301_vm0, %v1878_v8 }
  0x9f   : > { %v333_v10 = vpop.f32.mrf.mxu2 }
  0xa1   : > { %v338_v11 = vpop.f32.mrf.mxu3  ;;  %v2194_v12 = vpop.f32.mrf.mxu1 }
  0xa3   : > { %v325_v13 = vpop.f32.mrf.mxu0 }
  0xa7   : > { %v2196_v14 = vpop.f32.mrf.mxu2 }
  0xa9   : > { %v2198_v15 = vpop.f32.mrf.mxu3  ;;  %v408_v16 = vpop.f32.mrf.mxu1 }
  0xaa   : > { %v409_v17 = vadd.f32 %v408_v16, %v323_v9 }
  0xab   : > { %v733_v18 = vpop.f32.mrf.mxu0 }
  0xaf   : > { %v511_v19 = vpop.f32.mrf.mxu2 }
  0xb0   : > { %v531_v20 = vadd.f32 %v511_v19, %v409_v17 }
  0xb1   : > { %v622_v21 = vpop.f32.mrf.mxu3  ;;  %v410_v22 = vpop.f32.mrf.mxu1 }
  0xb2   : > { %v642_v23 = vadd.f32 %v622_v21, %v531_v20  ;;  %v411_v1 = vadd.f32 %v410_v22, %v325_v13  ;;  %v2225_v20 = vld [vmem:[%s2270_s2] ss:$0 sm:$0xff] }
  0xb3   : > { %v735_v24 = vpop.f32.mrf.mxu0 }
  0xb4   : > { %v753_v25 = vadd.f32 %v733_v18, %v642_v23 }
  0xb7   : > { %v513_v26 = vpop.f32.mrf.mxu2 }
  0xb8   : > { %v532_v3 = vadd.f32 %v513_v26, %v411_v1 }
  0xb9   : > { %v624_v27 = vpop.f32.mrf.mxu3  ;;  %v413_v28 = vpop.f32.mrf.mxu1 }
  0xba   : > { %v414_v29 = vadd.f32 %v413_v28, %v328_v6  ;;  %v643_v6 = vadd.f32 %v624_v27, %v532_v3 }
  0xbb   : > { %v738_v30 = vpop.f32.mrf.mxu0 }
  0xbc   : > { %v754_v16 = vadd.f32 %v735_v24, %v643_v6 }
  0xbf   : > { %v516_v31 = vpop.f32.mrf.mxu2 }
  0xc0   : > { %v533_v32 = vadd.f32 %v516_v31, %v414_v29 }
  0xc1   : > { %v627_v33 = vpop.f32.mrf.mxu3  ;;  %v415_v34 = vpop.f32.mrf.mxu1 }
  0xc2   : > { %v644_v35 = vadd.f32 %v627_v33, %v533_v32  ;;  %v416_v23 = vadd.f32 %v415_v34, %v2194_v12 }
  0xc3   : > { %v2200_v36 = vpop.f32.mrf.mxu0 }
  0xc4   : > { %v755_v37 = vadd.f32 %v738_v30, %v644_v35 }
  0xc7   : > { %v518_v38 = vpop.f32.mrf.mxu2 }
  0xc8   : > { %v534_v27 = vadd.f32 %v518_v38, %v416_v23 }
  0xc9   : > { %v629_v39 = vpop.f32.mrf.mxu3  ;;  %v418_v40 = vpop.f32.mrf.mxu1 }
  0xca   : > { %v419_v41 = vadd.f32 %v418_v40, %v333_v10  ;;  %v645_v32 = vadd.f32 %v629_v39, %v534_v27 }
  0xcb   : > { %v743_v42 = vpop.f32.mrf.mxu0 }
  0xcf   : > { %v521_v43 = vpop.f32.mrf.mxu2 }
  0xd0   : > { %v535_v44 = vadd.f32 %v521_v43, %v419_v41  ;;  %v756_v43 = vadd.f32 %v2200_v36, %v645_v32 }
  0xd1   : > { %v632_v45 = vpop.f32.mrf.mxu3  ;;  %v2202_v46 = vpop.f32.mrf.mxu1 }
  0xd2   : > { %v646_v47 = vadd.f32 %v632_v45, %v535_v44 }
  0xd3   : > { %v2204_v48 = vpop.f32.mrf.mxu0 }
  0xd4   : > { %v2206_v49 = vadd.f32 %v743_v42, %v646_v47 }
  0xd7   : > { %v2208_v50 = vpop.f32.mrf.mxu2 }
  0xd9   : > { %v2210_v51 = vpop.f32.mrf.mxu3  ;;  %v423_v52 = vpop.f32.mrf.mxu1 }
  0xda   : > { %v424_v53 = vadd.f32 %v423_v52, %v338_v11 }
  0xdb   : > { %v748_v54 = vpop.f32.mrf.mxu0 }
  0xdf   : > { %v526_v55 = vpop.f32.mrf.mxu2 }
  0xe0   : > { %v537_v56 = vadd.f32 %v526_v55, %v424_v53  ;;  %v421_v53 = vadd.f32 %v2202_v46, %v2196_v14 }
  0xe1   : > { %v637_v57 = vpop.f32.mrf.mxu3  ;;  %v2212_v58 = vpop.f32.mrf.mxu1 }
  0xe2   : > { %v648_v59 = vadd.f32 %v637_v57, %v537_v56  ;;  %v536_v55 = vadd.f32 %v2208_v50, %v421_v53 }
  0xe3   : > { %v2214_v60 = vpop.f32.mrf.mxu0 }
  0xe4   : > { %v2216_v61 = vadd.f32 %v748_v54, %v648_v59 }
  0xe7   : > { %v2218_v62 = vpop.f32.mrf.mxu2 }
  0xe9   : > { %v2220_v63 = vpop.f32.mrf.mxu3  ;;  %v844_v0 = vpop.f32.mrf.mxu1 }
  0xea   : > { %v864_v4 = vadd.f32 %v844_v0, %v753_v25 }
  0xeb   : > { %v1177_v2 = vpop.f32.mrf.mxu0 }
  0xef   : > { %v955_v5 = vpop.f32.mrf.mxu2 }
  0xf0   : > { %v975_v7 = vadd.f32 %v955_v5, %v864_v4 }
  0xf1   : > { %v1066_v8 = vpop.f32.mrf.mxu3  ;;  %v846_v9 = vpop.f32.mrf.mxu1 }
  0xf2   : > { %v1086_v11 = vadd.f32 %v1066_v8, %v975_v7  ;;  %v865_v17 = vadd.f32 %v846_v9, %v754_v16 }
  0xf3   : > { %v1179_v10 = vpop.f32.mrf.mxu0 }
  0xf4   : > { %v1197_v19 = vadd.f32 %v1177_v2, %v1086_v11  ;;  %v647_v2 = vadd.f32 %v2210_v51, %v536_v55  ;;  %v426_v51 = vadd.f32 %v2212_v58, %v2198_v15 }
  0xf6   : > { %v1209_v28 = vadd.f32 %v2225_v20, %v1197_v19  ;;  %v758_v50 = vadd.f32 %v2204_v48, %v647_v2  ;;  %v538_v19 = vadd.f32 %v2218_v62, %v426_v51 }
  0xf7   : > { %v957_v18 = vpop.f32.mrf.mxu2 }
  0xf8   : > { %v976_v13 = vadd.f32 %v957_v18, %v865_v17  ;;  %v1217_v33 = vmax.f32 %v1209_v28, 0.0 }
  0xf9   : > { %v1068_v21 = vpop.f32.mrf.mxu3  ;;  %v849_v22 = vpop.f32.mrf.mxu1 }
  0xfa   : > { %v1087_v25 = vadd.f32 %v1068_v21, %v976_v13  ;;  %v866_v30 = vadd.f32 %v849_v22, %v755_v37 }
  0xfb   : > { %v1182_v26 = vpop.f32.mrf.mxu0 }
  0xfc   : > { %v1198_v29 = vadd.f32 %v1179_v10, %v1087_v25  ;;  %v649_v25 = vadd.f32 %v2220_v63, %v538_v19 }
  0xfe   : > { %v1210_v24 = vadd.f32 %v2225_v20, %v1198_v29 }
  0xff   : > { %v960_v31 = vpop.f32.mrf.mxu2 }
 0x100   : > { %v1218_v35 = vmax.f32 %v1210_v24, 0.0  ;;  %v977_v40 = vadd.f32 %v960_v31, %v866_v30  ;;  %v760_v30 = vadd.f32 %v2214_v60, %v649_v25 }
 0x101   : > { %v1071_v41 = vpop.f32.mrf.mxu3  ;;  %v851_v12 = vpop.f32.mrf.mxu1 }
 0x102   : > { %v1886_v34 = vpack.c.bf16 %v1218_v35, %v1217_v33  ;;  %v1088_v42 = vadd.f32 %v1071_v41, %v977_v40  ;;  %v867_v37 = vadd.f32 %v851_v12, %v756_v43 }
 0x103   : > { %v1184_v38 = vpop.f32.mrf.mxu0 }
 0x104   : > { %1887 = vst [vmem:[%s2234_s30] sm:$0xff] %v1886_v34   ;;  %v1199_v39 = vadd.f32 %v1182_v26, %v1088_v42 }
 0x106   : > { %v1211_v56 = vadd.f32 %v2225_v20, %v1199_v39 }
 0x107   : > { %v962_v44 = vpop.f32.mrf.mxu2 }
 0x108   : > { %v978_v45 = vadd.f32 %v962_v44, %v867_v37  ;;  %v1219_v3 = vmax.f32 %v1211_v56, 0.0 }
 0x109   : > { %v1073_v47 = vpop.f32.mrf.mxu3  ;;  %v854_v52 = vpop.f32.mrf.mxu1 }
 0x10a   : > { %v1089_v54 = vadd.f32 %v1073_v47, %v978_v45  ;;  %v868_v36 = vadd.f32 %v854_v52, %v2206_v49 }
 0x10b   : > { %v1187_v59 = vpop.f32.mrf.mxu0 }
 0x10c   : > { %v1200_v57 = vadd.f32 %v1184_v38, %v1089_v54 }
 0x10e   : > { %v1212_v0 = vadd.f32 %v2225_v20, %v1200_v57 }
 0x10f   : > { %v965_v1 = vpop.f32.mrf.mxu2 }
 0x110   : > { %v1220_v4 = vmax.f32 %v1212_v0, 0.0  ;;  %v979_v5 = vadd.f32 %v965_v1, %v868_v36 }
 0x111   : > { %v1076_v6 = vpop.f32.mrf.mxu3  ;;  %v856_v14 = vpop.f32.mrf.mxu1 }
 0x112   : > { %v1891_v46 = vpack.c.bf16 %v1220_v4, %v1219_v3  ;;  %v1090_v7 = vadd.f32 %v1076_v6, %v979_v5  ;;  %v869_v8 = vadd.f32 %v856_v14, %v758_v50 }
 0x113   : > { %v1189_v9 = vpop.f32.mrf.mxu0 }
 0x114   : > { %1903 = vst [vmem:[%s2234_s30 + $0x8] sm:$0xff] %v1891_v46   ;;  %v1201_v11 = vadd.f32 %v1187_v59, %v1090_v7 }
 0x116   : > { %v1213_v13 = vadd.f32 %v2225_v20, %v1201_v11 }
 0x117   : > { %v967_v10 = vpop.f32.mrf.mxu2 }
 0x118   : > { %v980_v16 = vadd.f32 %v967_v10, %v869_v8  ;;  %v1221_v26 = vmax.f32 %v1213_v13, 0.0 }
 0x119   : > { %v1078_v17 = vpop.f32.mrf.mxu3  ;;  %v859_v49 = vpop.f32.mrf.mxu1 }
 0x11a   : > { %v1091_v18 = vadd.f32 %v1078_v17, %v980_v16  ;;  %v870_v48 = vadd.f32 %v859_v49, %v2216_v61 }
 0x11b   : > { %v1192_v24 = vpop.f32.mrf.mxu0 }
 0x11c   : > { %v1202_v21 = vadd.f32 %v1189_v9, %v1091_v18 }
 0x11e   : > { %v1214_v22 = vadd.f32 %v2225_v20, %v1202_v21 }
 0x11f   : > { %v970_v23 = vpop.f32.mrf.mxu2 }
 0x120   : > { %v1222_v27 = vmax.f32 %v1214_v22, 0.0  ;;  %v981_v28 = vadd.f32 %v970_v23, %v870_v48 }
 0x121   : > { %v1081_v29 = vpop.f32.mrf.mxu3  ;;  %v861_v58 = vpop.f32.mrf.mxu1 }
 0x122   : > { %v1896_v15 = vpack.c.bf16 %v1222_v27, %v1221_v26  ;;  %v1092_v62 = vadd.f32 %v1081_v29, %v981_v28  ;;  %v871_v31 = vadd.f32 %v861_v58, %v760_v30 }
 0x123   : > { %v1194_v41 = vpop.f32.mrf.mxu0 }
 0x124   : > { %1904 = vst [vmem:[%s2234_s30 + $0x10] sm:$0xff] %v1896_v15   ;;  %v1203_v33 = vadd.f32 %v1192_v24, %v1092_v62 }
 0x126   : > { %v1215_v63 = vadd.f32 %v2225_v20, %v1203_v33 }
 0x127   : > { %v972_v32 = vpop.f32.mrf.mxu2 }
 0x128   : > { %v982_v35 = vadd.f32 %v972_v32, %v871_v31  ;;  %v1223_v38 = vmax.f32 %v1215_v63, 0.0 }
 0x129   : > { %v1083_v61 = vpop.f32.mrf.mxu3 }
 0x12a   : > { %v1093_v40 = vadd.f32 %v1083_v61, %v982_v35 }
 0x12c   : > { %v1204_v12 = vadd.f32 %v1194_v41, %v1093_v40 }
 0x12e   : > { %v1216_v34 = vadd.f32 %v2225_v20, %v1204_v12 }
 0x130   : > { %v1224_v42 = vmax.f32 %v1216_v34, 0.0 }
 0x132   : > { %v1901_v43 = vpack.c.bf16 %v1224_v42, %v1223_v38 }
 0x134   : > { %1905 = vst [vmem:[%s2234_s30 + $0x18] sm:$0xff] %v1901_v43  }
 0x135 PF: > { %s13_s14 = sadd.s32 1, %s1966_s14   ;;  %s2272_s12 = smov %s1962_s13 }
 0x136   : > { %p10_p5 = scmp.ge.s32.totalorder %s13_s14, 4   ;;  %s2273_s13 = smov %s2275_s15 }
 0x138   :  { %12 = sbr.rel (!%p10_p5) target bundleno = 2 (0x2), region = 84 }

// kernel: basic_block_forward.3
= control target key start
LH: loop header
LB: loop body
LE: loop exit
PB: predicated region body
PF: predicated region fallthrough
CT: control target
= control target key end

     0   :  { %11 = vsyncpa [#allocation3], 0  ;;  %s3326_s0 = inlined_call_operand.vmem [shape: bf16[2,3,1,10,8,128], index: 0, kind: input, shape index: {}]   ;;  %s3327_s1 = inlined_call_operand.vmem [shape: bf16[9,128,128], index: 1, kind: input, shape index: {}]   ;;  %s3328_s2 = inlined_call_operand.vmem [shape: f32[1,128], index: 2, kind: input, shape index: {}]   ;;  %s3329_s3 = inlined_call_operand.vmem [shape: bf16[2,8,8,64], index: 3, kind: input, shape index: {}]   ;;  %s3330_s4 = inlined_call_operand.vmem [shape: bf16[64,128], index: 4, kind: input, shape index: {}]   ;;  %s3331_s5 = inlined_call_operand.vmem [shape: f32[1,128], index: 5, kind: input, shape index: {}]   ;;  %s3332_s6 = inlined_call_operand.hbm [shape: bf16[2,8,8,128], index: 6, kind: output, shape index: {}]  }
   0x1   :  { %13 = vsyncpa [#allocation3 + $0x1], 0  ;;  %s2861_s21 = smov 0   ;;  %s2863_s22 = smov 0  }
   0x2   :  { %s2865_s23 = smov 0   ;;  %s2867_s24 = smov 0  }
   0x3   :  { %s2869_s25 = smov 0   ;;  %s2871_s26 = smov 0  }
   0x4 LB: > { %s1849_s27 = sadd.s32 4294967295, %s2822_s26   ;;  %s1850_s28 = sadd.s32 4294967294, %s2822_s26   ;;  %s2822_s26 = sphi %s2871_s26, %s19_s26   ;;  %s2818_s25 = sphi %s2869_s25, %s3339_s25   ;;  %s2814_s24 = sphi %s2867_s24, %s3338_s24   ;;  %s2810_s23 = sphi %s2865_s23, %s3337_s23   ;;  %s2806_s22 = sphi %s2863_s22, %s3336_s22   ;;  %s2802_s21 = sphi %s2861_s21, %s3335_s21  }
   0x5   : > { %s31_s29 = sadd.s32 1, %s2818_s25  ;;  %s196_s30 = sadd.s32 1, %s2810_s23 }
   0x6   : > { %p33_p0 = scmp.ge.s32.totalorder %s31_s29, 2  ;;  %p206_p1 = scmp.ne.s32.totalorder %s2810_s23, %s2806_s22 }
   0x7   : > { %p207_p2 = scmp.eq.s32.totalorder %s1849_s27, 1  ;;  %p212_p3 = scmp.ne.s32.totalorder %s2806_s22, %s2802_s21 }
   0x8   : > { %s3341_s29 = smov (%p33_p0, %s31_s29), 0  ;;  %p213_p5 = scmp.eq.s32.totalorder %s1850_s28, 1 }
   0x9   : > { %p2901_p4 = por %p207_p2, %p206_p1  ;;  %s191_s8 = ssub.s32 %s2818_s25, %s3341_s29 }
   0xa   : > { %p1857_p6 = scmp.ge.s32.totalorder %s2822_s26, 1  ;;  %p194_p7 = scmp.eq.s32.totalorder %s191_s8, 0 }
   0xb   : > { %p2908_p8 = por %p213_p5, %p212_p3  ;;  %p273_p9 = scmp.lt.s32.totalorder %s2822_s26, 3 }
   0xc   : > { %s2914_s10 = scalar_select %p194_p7, %s2810_s23, %s196_s30  }
   0xd   : > { %p274_p10 = pnand %p1857_p6, %p273_p9 }
   0xe   : > { %p322_p11 = scmp.lt.s32.totalorder (!%p274_p10), %s2814_s24, 1  ;;  %s319_s13 = sand.u32 (!%p274_p10), 1, %s2806_s22  }
   0xf   : > { %277 = sbr.rel (%p274_p10) target bundleno = 354 (0x162), region = 44  ;;  %s1858_s14 = sshll.u32 (!%p274_p10), %s319_s13, 5 }
  0x10   : > { %s3256_s15 = scalar_lea.vmem (!%p274_p10), [#allocation2], %s1858_s14  ;;  %s2644_s16 = sshll.u32 (!%p274_p10), %s2814_s24, 5 }
  0x11   : > { %s1708_s28 = sshll.u32 (!%p274_p10), %s3256_s15, 4  ;;  %s1709_s28 = int_to_ptr.vmem [resolvable:$true] %s1708_s28 }
  0x14   : > { %v2551_v0 = vld [vmem:[%s3327_s1 + $0x78] sm:$0xff]  ;;  %v2550_v2 = vld [vmem:[%s3327_s1 + $0x70] sm:$0xff]  ;;  %v2549_v4 = vld [vmem:[%s3327_s1 + $0x68] sm:$0xff]  ;;  %s2954_s27 = scalar_select %p322_p11, %s2814_s24, 1  ;;  %vm1620_vm0 = vcmask 523264  }
  0x15   : > { %v2539_v1 = vld [vmem:[%s3327_s1 + $0x38] sm:$0xff]  ;;  %2668 = vmatpush.bf16.msra.mxu2 %v2551_v0  ;;  %v2538_v3 = vld [vmem:[%s3327_s1 + $0x30] sm:$0xff]  ;;  %469 = vmatpush.bf16.msra.mxu0 %v2551_v0  ;;  %v2537_v5 = vld [vmem:[%s3327_s1 + $0x28] sm:$0xff]  ;;  %s1695_s24 = scalar_lea.sflag [#allocation3], %s319_s13 }
  0x16   : > { %2676 = vmatpush.bf16.msra.mxu3 %v2539_v1  ;;  %570 = vmatpush.bf16.msra.mxu1 %v2539_v1  ;;  %v2548_v6 = vld [vmem:[%s3327_s1 + $0x60] sm:$0xff]  ;;  %v2547_v8 = vld [vmem:[%s3327_s1 + $0x58] sm:$0xff]  ;;  %v2546_v10 = vld [vmem:[%s3327_s1 + $0x50] sm:$0xff]  ;;  %s2684_s12 = smul.u32 120, %s2954_s27  ;;  %s2527_s20 = sshll.u32 %s2954_s27, 5 }
  0x17   : > { %v2536_v7 = vld [vmem:[%s3327_s1 + $0x20] sm:$0xff]  ;;  %v2535_v9 = vld [vmem:[%s3327_s1 + $0x18] sm:$0xff]  ;;  %v2534_v11 = vld [vmem:[%s3327_s1 + $0x10] sm:$0xff]  ;;  %s3182_s8 = scalar_lea.vmem %s3329_s3, %s2527_s20  ;;  %s1707_s20 = scalar_lea.hbm %s3332_s6, %s2644_s16 }
  0x18   : > { %v2545_v12 = vld [vmem:[%s3327_s1 + $0x48] sm:$0xff]  ;;  %v2544_v14 = vld [vmem:[%s3327_s1 + $0x40] sm:$0xff]  ;;  %s2972_s19 = scalar_lea.vmem %s3326_s0, %s2684_s12  ;;  %v2563_v16 = vld [vmem:[%s3327_s1 + $0xb8] sm:$0xff]  ;;  %s1710_s30 = sshll.u32 %s1707_s20, 4  ;;  %s1711_s30 = int_to_ptr.hbm [resolvable:$true] %s1710_s30 }
  0x19   : > { %2669 = vmatpush.bf16.msra.mxu2 %v2550_v2  ;;  %470 = vmatpush.bf16.msra.mxu0 %v2550_v2  ;;  %v2533_v13 = vld [vmem:[%s3327_s1 + $0x8] sm:$0xff]  ;;  %v2532_v15 = vld [vmem:[%s3327_s1] sm:$0xff]  ;;  %v2575_v17 = vld [vmem:[%s3327_s1 + $0xf8] sm:$0xff]  ;;  %s2764_s12 = scalar_lea.hbm %s3332_s6, 64 }
  0x1a   : > { %2677 = vmatpush.bf16.msra.mxu3 %v2538_v3  ;;  %571 = vmatpush.bf16.msra.mxu1 %v2538_v3  ;;  %v2542_v18 = vld [vmem:[%s2972_s19 + $0x38] sm:$0xff]  ;;  %v2530_v19 = vld [vmem:[%s2972_s19 + $0x10] sm:$0xff]  ;;  %v2540_v20 = vld [vmem:[%s2972_s19 + $0x28] sm:$0xff] }
  0x1b   : > { %v2528_v21 = vld [vmem:[%s2972_s19] sm:$0xff]  ;;  %v2587_v22 = vld [vmem:[%s3327_s1 + $0x138] sm:$0xff]  ;;  %v2562_v24 = vld [vmem:[%s3327_s1 + $0xb0] sm:$0xff] }
  0x1c   : > { %v2599_v23 = vld [vmem:[%s3327_s1 + $0x178] sm:$0xff]  ;;  %v2574_v25 = vld [vmem:[%s3327_s1 + $0xf0] sm:$0xff]  ;;  %v2561_v28 = vld [vmem:[%s3327_s1 + $0xa8] sm:$0xff] }
  0x1d   : > { %2670 = vmatpush.bf16.msra.mxu2 %v2549_v4  ;;  %471 = vmatpush.bf16.msra.mxu0 %v2549_v4  ;;  %v2586_v26 = vld [vmem:[%s3327_s1 + $0x130] sm:$0xff]  ;;  %v2573_v29 = vld [vmem:[%s3327_s1 + $0xe8] sm:$0xff]  ;;  %v2560_v32 = vld [vmem:[%s3327_s1 + $0xa0] sm:$0xff] }
  0x1e   : > { %2678 = vmatpush.bf16.msra.mxu3 %v2537_v5  ;;  %572 = vmatpush.bf16.msra.mxu1 %v2537_v5  ;;  %v2598_v27 = vld [vmem:[%s3327_s1 + $0x170] sm:$0xff]  ;;  %v2585_v30 = vld [vmem:[%s3327_s1 + $0x128] sm:$0xff]  ;;  %v2572_v33 = vld [vmem:[%s3327_s1 + $0xe0] sm:$0xff] }
  0x1f   : > { %v2597_v31 = vld [vmem:[%s3327_s1 + $0x168] sm:$0xff]  ;;  %v2584_v34 = vld [vmem:[%s3327_s1 + $0x120] sm:$0xff]  ;;  %v2559_v36 = vld [vmem:[%s3327_s1 + $0x98] sm:$0xff] }
  0x20   : > { %v2596_v35 = vld [vmem:[%s3327_s1 + $0x160] sm:$0xff]  ;;  %v2571_v37 = vld [vmem:[%s3327_s1 + $0xd8] sm:$0xff]  ;;  %v2541_v40 = vld [vmem:[%s2972_s19 + $0x30] sm:$0xff] }
  0x21   : > { %2671 = vmatpush.bf16.msra.mxu2 %v2548_v6  ;;  %472 = vmatpush.bf16.msra.mxu0 %v2548_v6  ;;  %v2543_v38 = vld [vmem:[%s2972_s19 + $0x40] sm:$0xff]  ;;  %v2531_v39 = vld [vmem:[%s2972_s19 + $0x18] sm:$0xff]  ;;  %v2529_v41 = vld [vmem:[%s2972_s19 + $0x8] sm:$0xff] }
  0x22   : > { %2679 = vmatpush.bf16.msra.mxu3 %v2536_v7  ;;  %573 = vmatpush.bf16.msra.mxu1 %v2536_v7  ;;  %v2583_v42 = vld [vmem:[%s3327_s1 + $0x118] sm:$0xff]  ;;  %v2558_v44 = vld [vmem:[%s3327_s1 + $0x90] sm:$0xff]  ;;  %v2557_v48 = vld [vmem:[%s3327_s1 + $0x88] sm:$0xff] }
  0x23   : > { %v2595_v43 = vld [vmem:[%s3327_s1 + $0x158] sm:$0xff]  ;;  %v2570_v45 = vld [vmem:[%s3327_s1 + $0xd0] sm:$0xff]  ;;  %v2569_v49 = vld [vmem:[%s3327_s1 + $0xc8] sm:$0xff] }
  0x24   : > { %v2582_v46 = vld [vmem:[%s3327_s1 + $0x110] sm:$0xff]  ;;  %v2581_v50 = vld [vmem:[%s3327_s1 + $0x108] sm:$0xff]  ;;  %v2556_v52 = vld [vmem:[%s3327_s1 + $0x80] sm:$0xff] }
  0x25   : > { %2672 = vmatpush.bf16.msra.mxu2 %v2547_v8  ;;  %473 = vmatpush.bf16.msra.mxu0 %v2547_v8  ;;  %v2594_v47 = vld [vmem:[%s3327_s1 + $0x150] sm:$0xff]  ;;  %v2593_v51 = vld [vmem:[%s3327_s1 + $0x148] sm:$0xff]  ;;  %v2568_v53 = vld [vmem:[%s3327_s1 + $0xc0] sm:$0xff] }
  0x26   : > { %2680 = vmatpush.bf16.msra.mxu3 %v2535_v9  ;;  %574 = vmatpush.bf16.msra.mxu1 %v2535_v9  ;;  %v2611_v54 = vld [vmem:[%s3327_s1 + $0x1b8] sm:$0xff]  ;;  %v2580_v56 = vld [vmem:[%s3327_s1 + $0x100] sm:$0xff]  ;;  %v2552_v60 = vld [vmem:[%s2972_s19 + $0x50] sm:$0xff] }
  0x27   : > { %v2623_v55 = vld [vmem:[%s3327_s1 + $0x1f8] sm:$0xff]  ;;  %v2592_v57 = vld [vmem:[%s3327_s1 + $0x140] sm:$0xff]  ;;  %v2576_v62 = vld [vmem:[%s2972_s19 + $0x2c] sm:$0xff] }
  0x28   : > { %v2635_v58 = vld [vmem:[%s3327_s1 + $0x238] sm:$0xff]  ;;  %v2564_v61 = vld [vmem:[%s2972_s19 + $0x4] sm:$0xff]  ;;  %v2610_v0 = vld [vmem:[%s3327_s1 + $0x1b0] sm:$0xff] }
  0x29   : > { %2673 = vmatpush.bf16.msra.mxu2 %v2546_v10  ;;  %474 = vmatpush.bf16.msra.mxu0 %v2546_v10  ;;  %v2643_v59 = vld [vmem:[%s3330_s4 + $0x18] sm:$0xff]  ;;  %v2622_v1 = vld [vmem:[%s3327_s1 + $0x1f0] sm:$0xff]  ;;  %v2609_v4 = vld [vmem:[%s3327_s1 + $0x1a8] sm:$0xff] }
  0x2a   : > { %2681 = vmatpush.bf16.msra.mxu3 %v2534_v11  ;;  %575 = vmatpush.bf16.msra.mxu1 %v2534_v11  ;;  %v2588_v63 = vld [vmem:[%s2972_s19 + $0x54] sm:$0xff]  ;;  %v2621_v5 = vld [vmem:[%s3327_s1 + $0x1e8] sm:$0xff]  ;;  %v2608_v8 = vld [vmem:[%s3327_s1 + $0x1a0] sm:$0xff] }
  0x2b   : > { %v2634_v2 = vld [vmem:[%s3327_s1 + $0x230] sm:$0xff]  ;;  %v2633_v6 = vld [vmem:[%s3327_s1 + $0x228] sm:$0xff]  ;;  %v2620_v9 = vld [vmem:[%s3327_s1 + $0x1e0] sm:$0xff] }
  0x2c   : > { %v2642_v3 = vld [vmem:[%s3330_s4 + $0x10] sm:$0xff]  ;;  %v2641_v7 = vld [vmem:[%s3330_s4 + $0x8] sm:$0xff]  ;;  %v2632_v10 = vld [vmem:[%s3327_s1 + $0x220] sm:$0xff] }
  0x2d   : > { %2674 = vmatpush.bf16.msra.mxu2 %v2545_v12  ;;  %475 = vmatpush.bf16.msra.mxu0 %v2545_v12  ;;  %v2607_v11 = vld [vmem:[%s3327_s1 + $0x198] sm:$0xff] }
  0x2e   : > { %2682 = vmatpush.bf16.msra.mxu3 %v2533_v13  ;;  %576 = vmatpush.bf16.msra.mxu1 %v2533_v13  ;;  %v2619_v12 = vld [vmem:[%s3327_s1 + $0x1d8] sm:$0xff] }
  0x2f   : > { %v2631_v13 = vld [vmem:[%s3327_s1 + $0x218] sm:$0xff] }
  0x31   : > { %2675 = vmatpush.bf16.msra.mxu2 %v2544_v14  ;;  %476 = vmatpush.bf16.msra.mxu0 %v2544_v14  ;;  %v2553_v14 = vld [vmem:[%s2972_s19 + $0x58] sm:$0xff] }
  0x32   : > { %2683 = vmatpush.bf16.msra.mxu3 %v2532_v15  ;;  %577 = vmatpush.bf16.msra.mxu1 %v2532_v15  ;;  %v2565_v15 = vld [vmem:[%s2972_s19 + $0xc] sm:$0xff] }
  0x34   : > { %487 = vmatmul.bf16.vlgmr.msra.gmra.mxu2 %v2542_v18  ;;  %477 = vmatmul.bf16.vlgmr.msra.gmra.mxu0 %v2540_v20  ;;  %v2606_v18 = vld [vmem:[%s3327_s1 + $0x190] sm:$0xff] }
  0x35   : > { %697 = vmatpush.bf16.msrb.mxu2 %v2563_v16  ;;  %588 = vmatmul.bf16.vlgmr.msra.gmra.mxu3 %v2530_v19  ;;  %v2577_v16 = vld [vmem:[%s2972_s19 + $0x34] sm:$0xff] }
  0x36   : > { %832 = vmatpush.bf16.msrb.mxu3 %v2575_v17  ;;  %578 = vmatmul.bf16.vlgmr.msra.gmra.mxu1 %v2528_v21  ;;  %v2589_v17 = vld [vmem:[%s2972_s19 + $0x5c] sm:$0xff]  ;;  %v2618_v19 = vld [vmem:[%s3327_s1 + $0x1d0] sm:$0xff]  ;;  %v2605_v21 = vld [vmem:[%s3327_s1 + $0x188] sm:$0xff] }
  0x37   : > { %967 = vmatpush.bf16.msrb.mxu0 %v2587_v22  ;;  %1102 = vmatpush.bf16.msrb.mxu1 %v2599_v23  ;;  %v2630_v20 = vld [vmem:[%s3327_s1 + $0x210] sm:$0xff]  ;;  %v2617_v22 = vld [vmem:[%s3327_s1 + $0x1c8] sm:$0xff] }
  0x38   : > { %v2629_v23 = vld [vmem:[%s3327_s1 + $0x208] sm:$0xff] }
  0x39   : > { %698 = vmatpush.bf16.msrb.mxu2 %v2562_v24  ;;  %v2640_v24 = vld [vmem:[%s3330_s4] sm:$0xff] }
  0x3a   : > { %833 = vmatpush.bf16.msrb.mxu3 %v2574_v25  ;;  %v2604_v25 = vld [vmem:[%s3327_s1 + $0x180] sm:$0xff] }
  0x3b   : > { %968 = vmatpush.bf16.msrb.mxu0 %v2586_v26  ;;  %1103 = vmatpush.bf16.msrb.mxu1 %v2598_v27  ;;  %v2616_v26 = vld [vmem:[%s3327_s1 + $0x1c0] sm:$0xff] }
  0x3c   : > { %v2628_v27 = vld [vmem:[%s3327_s1 + $0x200] sm:$0xff] }
  0x3d   : > { %699 = vmatpush.bf16.msrb.mxu2 %v2561_v28  ;;  %v2554_v28 = vld [vmem:[%s2972_s19 + $0x60] sm:$0xff] }
  0x3e   : > { %834 = vmatpush.bf16.msrb.mxu3 %v2573_v29  ;;  %v2566_v29 = vld [vmem:[%s2972_s19 + $0x14] sm:$0xff] }
  0x3f   : > { %969 = vmatpush.bf16.msrb.mxu0 %v2585_v30  ;;  %1104 = vmatpush.bf16.msrb.mxu1 %v2597_v31  ;;  %v2578_v30 = vld [vmem:[%s2972_s19 + $0x3c] sm:$0xff]  ;;  %v2590_v31 = vld [vmem:[%s2972_s19 + $0x64] sm:$0xff] }
  0x41   : > { %700 = vmatpush.bf16.msrb.mxu2 %v2560_v32  ;;  %v2555_v32 = vld [vmem:[%s2972_s19 + $0x68] sm:$0xff] }
  0x42   : > { %835 = vmatpush.bf16.msrb.mxu3 %v2572_v33  ;;  %v2567_v33 = vld [vmem:[%s2972_s19 + $0x1c] sm:$0xff] }
  0x43   : > { %970 = vmatpush.bf16.msrb.mxu0 %v2584_v34  ;;  %1105 = vmatpush.bf16.msrb.mxu1 %v2596_v35  ;;  %v2579_v34 = vld [vmem:[%s2972_s19 + $0x44] sm:$0xff]  ;;  %v2591_v35 = vld [vmem:[%s2972_s19 + $0x6c] sm:$0xff] }
  0x44   : > { %492 = vmatmul.bf16.gmra.mxu2 %v2543_v38  ;;  %482 = vmatmul.bf16.gmra.mxu0 %v2541_v40  ;;  %v2624_v38 = vld [vmem:[%s2972_s19 + $0x58] sm:$0xff]  ;;  %v2601_v40 = vld [vmem:[%s2972_s19 + $0x10] sm:$0xff] }
  0x45   : > { %701 = vmatpush.bf16.msrb.mxu2 %v2559_v36  ;;  %593 = vmatmul.bf16.gmra.mxu3 %v2531_v39  ;;  %v2600_v36 = vld [vmem:[%s2972_s19 + $0x8] sm:$0xff]  ;;  %v2636_v39 = vld [vmem:[%s3182_s8] sm:$0xff] }
  0x46   : > { %836 = vmatpush.bf16.msrb.mxu3 %v2571_v37  ;;  %583 = vmatmul.bf16.gmra.mxu1 %v2529_v41  ;;  %v2612_v37 = vld [vmem:[%s2972_s19 + $0x30] sm:$0xff]  ;;  %v2613_v41 = vld [vmem:[%s2972_s19 + $0x38] sm:$0xff] }
  0x47   : > { %971 = vmatpush.bf16.msrb.mxu0 %v2583_v42  ;;  %1106 = vmatpush.bf16.msrb.mxu1 %v2595_v43  ;;  %v2625_v42 = vld [vmem:[%s2972_s19 + $0x60] sm:$0xff]  ;;  %v2637_v43 = vld [vmem:[%s3182_s8 + $0x8] sm:$0xff] }
  0x49   : > { %702 = vmatpush.bf16.msrb.mxu2 %v2558_v44  ;;  %v2602_v44 = vld [vmem:[%s2972_s19 + $0x18] sm:$0xff] }
  0x4a   : > { %837 = vmatpush.bf16.msrb.mxu3 %v2570_v45  ;;  %v2614_v45 = vld [vmem:[%s2972_s19 + $0x40] sm:$0xff] }
  0x4b   : > { %972 = vmatpush.bf16.msrb.mxu0 %v2582_v46  ;;  %1107 = vmatpush.bf16.msrb.mxu1 %v2594_v47  ;;  %v2626_v46 = vld [vmem:[%s2972_s19 + $0x68] sm:$0xff]  ;;  %v2638_v47 = vld [vmem:[%s3182_s8 + $0x10] sm:$0xff] }
  0x4d   : > { %703 = vmatpush.bf16.msrb.mxu2 %v2557_v48 }
  0x4e   : > { %838 = vmatpush.bf16.msrb.mxu3 %v2569_v49 }
  0x4f   : > { %973 = vmatpush.bf16.msrb.mxu0 %v2581_v50  ;;  %1108 = vmatpush.bf16.msrb.mxu1 %v2593_v51 }
  0x51   : > { %704 = vmatpush.bf16.msrb.mxu2 %v2556_v52 }
  0x52   : > { %839 = vmatpush.bf16.msrb.mxu3 %v2568_v53 }
  0x53   : > { %974 = vmatpush.bf16.msrb.mxu0 %v2580_v56  ;;  %1109 = vmatpush.bf16.msrb.mxu1 %v2592_v57 }
  0x54   : > { %705 = vmatmul.bf16.vlgmr.msrb.gmra.mxu2 %v2552_v60  ;;  %v2603_v60 = vld [vmem:[%s2972_s19 + $0x20] sm:$0xff] }
  0x55   : > { %1237 = vmatpush.bf16.msra.mxu2 %v2611_v54  ;;  %840 = vmatmul.bf16.vlgmr.msrb.gmra.mxu3 %v2564_v61  ;;  %v2615_v61 = vld [vmem:[%s2972_s19 + $0x48] sm:$0xff] }
  0x56   : > { %1372 = vmatpush.bf16.msra.mxu3 %v2623_v55  ;;  %975 = vmatmul.bf16.vlgmr.msrb.gmra.mxu0 %v2576_v62  ;;  %v2627_v62 = vld [vmem:[%s2972_s19 + $0x70] sm:$0xff] }
  0x57   : > { %1507 = vmatpush.bf16.msra.mxu0 %v2635_v58  ;;  %1637 = vmatpush.bf16.msra.mxu1 %v2643_v59 }
  0x58   : > { %1110 = vmatmul.bf16.vlgmr.msrb.gmra.mxu1 %v2588_v63  ;;  %v2639_v63 = vld [vmem:[%s3182_s8 + $0x18] sm:$0xff]  ;;  %s2758_s8 = sshra.s32 %s1711_s30, 4  ;;  %s2759_s8 = int_to_ptr.hbm [resolvable:$true] %s2758_s8 }
  0x59   : > { %1238 = vmatpush.bf16.msra.mxu2 %v2610_v0  ;;  %s2760_s27 = scalar_lea.hbm %s2759_s8, 32  ;;  %p2765_p1 = scmp.lt.s32.totalorder %s2759_s8, %s3332_s6 }
  0x5a   : > { %1373 = vmatpush.bf16.msra.mxu3 %v2622_v1  ;;  %p2761_p12 = scmp.ne.s32.totalorder %s2759_s8, %s2760_s27  ;;  %p2766_p2 = scmp.lt.s32.totalorder %s2764_s12, %s2760_s27 }
  0x5b   : > { %1508 = vmatpush.bf16.msra.mxu0 %v2634_v2  ;;  %1638 = vmatpush.bf16.msra.mxu1 %v2642_v3 }
  0x5c   : > { %p2762_p13 = pnand %p2761_p12, %p2901_p4  ;;  %p2767_p3 = por %p2766_p2, %p2765_p1 }
  0x5d   : > { %1239 = vmatpush.bf16.msra.mxu2 %v2609_v4 }
  0x5e   : > { %1374 = vmatpush.bf16.msra.mxu3 %v2621_v5  ;;  %p2763_p0 = pneg %p2762_p13 }
  0x5f   : > { %1509 = vmatpush.bf16.msra.mxu0 %v2633_v6  ;;  %1639 = vmatpush.bf16.msra.mxu1 %v2641_v7 }
  0x60   : > { %p2768_p5 = pnand %p2767_p3, %p2763_p0 }
  0x61   : > { %1240 = vmatpush.bf16.msra.mxu2 %v2608_v8 }
  0x62   : > { %1375 = vmatpush.bf16.msra.mxu3 %v2620_v9 }
  0x63   : > { %1510 = vmatpush.bf16.msra.mxu0 %v2632_v10  ;;  %1640 = vmatpush.bf16.msra.mxu1 %v2640_v24 }
  0x64   : > { %710 = vmatmul.bf16.gmra.mxu2 %v2553_v14 }
  0x65   : > { %1241 = vmatpush.bf16.msra.mxu2 %v2607_v11  ;;  %845 = vmatmul.bf16.gmra.mxu3 %v2565_v15 }
  0x66   : > { %1376 = vmatpush.bf16.msra.mxu3 %v2619_v12  ;;  %980 = vmatmul.bf16.gmra.mxu0 %v2577_v16 }
  0x67   : > { %1511 = vmatpush.bf16.msra.mxu0 %v2631_v13 }
  0x68   : > { %1115 = vmatmul.bf16.gmra.mxu1 %v2589_v17 }
  0x69   : > { %1242 = vmatpush.bf16.msra.mxu2 %v2606_v18 }
  0x6a   : > { %1377 = vmatpush.bf16.msra.mxu3 %v2618_v19 }
  0x6b   : > { %1512 = vmatpush.bf16.msra.mxu0 %v2630_v20 }
  0x6d   : > { %1243 = vmatpush.bf16.msra.mxu2 %v2605_v21 }
  0x6e   : > { %1378 = vmatpush.bf16.msra.mxu3 %v2617_v22 }
  0x6f   : > { %1513 = vmatpush.bf16.msra.mxu0 %v2629_v23 }
  0x71   : > { %1244 = vmatpush.bf16.msra.mxu2 %v2604_v25 }
  0x72   : > { %1379 = vmatpush.bf16.msra.mxu3 %v2616_v26 }
  0x73   : > { %1514 = vmatpush.bf16.msra.mxu0 %v2628_v27 }
  0x74   : > { %715 = vmatmul.bf16.gmra.mxu2 %v2554_v28 }
  0x75   : > { %850 = vmatmul.bf16.gmra.mxu3 %v2566_v29 }
  0x76   : > { %985 = vmatmul.bf16.gmra.mxu0 %v2578_v30 }
  0x78   : > { %1120 = vmatmul.bf16.gmra.mxu1 %v2590_v31 }
  0x84   : > { %720 = vmatmul.bf16.gmra.mxu2 %v2555_v32 }
  0x85   : > { %855 = vmatmul.bf16.gmra.mxu3 %v2567_v33 }
  0x86   : > { %990 = vmatmul.bf16.gmra.mxu0 %v2579_v34 }
  0x88   : > { %1125 = vmatmul.bf16.gmra.mxu1 %v2591_v35 }
  0x94   : > { %1245 = vmatmul.bf16.vlgmr.msra.gmra.mxu2 %v2600_v36 }
  0x95   : > { %1380 = vmatmul.bf16.vlgmr.msra.gmra.mxu3 %v2612_v37 }
  0x96   : > { %1515 = vmatmul.bf16.vlgmr.msra.gmra.mxu0 %v2624_v38 }
  0x98   : > { %2518 = vmatmul.msk.bf16.vlgmr.msra.gmra.mxu1 %vm1620_vm0, %v2636_v39 }
  0xa4   : > { %1250 = vmatmul.bf16.gmra.mxu2 %v2601_v40 }
  0xa5   : > { %1385 = vmatmul.bf16.gmra.mxu3 %v2613_v41 }
  0xa6   : > { %1520 = vmatmul.bf16.gmra.mxu0 %v2625_v42 }
  0xa8   : > { %2519 = vmatmul.msk.bf16.gmra.mxu1 %vm1620_vm0, %v2637_v43 }
  0xb1   : > { %v478_v48 = vpop.f32.mrf.mxu0 }
  0xb3   : > { %v579_v49 = vpop.f32.mrf.mxu1 }
  0xb4   : > { %v580_v50 = vadd.f32 %v579_v49, %v478_v48  ;;  %1255 = vmatmul.bf16.gmra.mxu2 %v2602_v44 }
  0xb5   : > { %1390 = vmatmul.bf16.gmra.mxu3 %v2614_v45 }
  0xb6   : > { %1525 = vmatmul.bf16.gmra.mxu0 %v2626_v46 }
  0xb7   : > { %v488_v51 = vpop.f32.mrf.mxu2 }
  0xb8   : > { %2520 = vmatmul.msk.bf16.gmra.mxu1 %vm1620_vm0, %v2638_v47  ;;  %v589_v52 = vpop.f32.mrf.mxu3 }
  0xb9   : > { %v590_v53 = vadd.f32 %v589_v52, %v488_v51  ;;  %v480_v54 = vpop.f32.mrf.mxu0 }
  0xbb   : > { %v581_v55 = vpop.f32.mrf.mxu1 }
  0xbc   : > { %v3199_v56 = vadd.f32 %v581_v55, %v480_v54 }
  0xbf   : > { %v490_v57 = vpop.f32.mrf.mxu2 }
  0xc0   : > { %v591_v58 = vpop.f32.mrf.mxu3 }
  0xc1   : > { %v3201_v59 = vadd.f32 %v591_v58, %v490_v57  ;;  %v483_v0 = vpop.f32.mrf.mxu0 }
  0xc3   : > { %v584_v1 = vpop.f32.mrf.mxu1 }
  0xc4   : > { %v585_v2 = vadd.f32 %v584_v1, %v483_v0  ;;  %1260 = vmatmul.bf16.gmra.mxu2 %v2603_v60 }
  0xc5   : > { %1395 = vmatmul.bf16.gmra.mxu3 %v2615_v61 }
  0xc6   : > { %1530 = vmatmul.bf16.gmra.mxu0 %v2627_v62 }
  0xc7   : > { %v493_v3 = vpop.f32.mrf.mxu2 }
  0xc8   : > { %2521 = vmatmul.msk.bf16.gmra.mxu1 %vm1620_vm0, %v2639_v63  ;;  %v594_v4 = vpop.f32.mrf.mxu3 }
  0xc9   : > { %v595_v5 = vadd.f32 %v594_v4, %v493_v3  ;;  %v485_v6 = vpop.f32.mrf.mxu0 }
  0xcb   : > { %v586_v7 = vpop.f32.mrf.mxu1 }
  0xcc   : > { %v3208_v8 = vadd.f32 %v586_v7, %v485_v6 }
  0xcf   : > { %v495_v9 = vpop.f32.mrf.mxu2 }
  0xd0   : > { %v596_v10 = vpop.f32.mrf.mxu3 }
  0xd1   : > { %v3210_v11 = vadd.f32 %v596_v10, %v495_v9  ;;  %v3240_v10 = vld [vmem:[%s3331_s5] ss:$0 sm:$0xff] }
  0xd3   : > { %v976_v12 = vpop.f32.mrf.mxu0 }
  0xd5   : > { %v1111_v13 = vpop.f32.mrf.mxu1 }
  0xd7   : > { %v706_v14 = vpop.f32.mrf.mxu2 }
  0xd8   : > { %v841_v15 = vpop.f32.mrf.mxu3  ;;  %v726_v16 = vadd.f32 %v706_v14, %v580_v50 }
  0xda   : > { %v861_v17 = vadd.f32 %v841_v15, %v726_v16 }
  0xdb   : > { %v978_v18 = vpop.f32.mrf.mxu0 }
  0xdc   : > { %v996_v20 = vadd.f32 %v976_v12, %v861_v17 }
  0xdd   : > { %v1113_v19 = vpop.f32.mrf.mxu1 }
  0xde   : > { %v1131_v21 = vadd.f32 %v1111_v13, %v996_v20 }
  0xdf   : > { %v708_v22 = vpop.f32.mrf.mxu2 }
  0xe0   : > { %v843_v23 = vpop.f32.mrf.mxu3  ;;  %v727_v62 = vadd.f32 %v708_v22, %v3199_v56  ;;  %v3245_v56 = vld [vmem:[%s3328_s2] ss:$0 sm:$0xff] }
  0xe2   : > { %v862_v1 = vadd.f32 %v843_v23, %v727_v62 }
  0xe3   : > { %v981_v24 = vpop.f32.mrf.mxu0 }
  0xe5   : > { %v1116_v25 = vpop.f32.mrf.mxu1 }
  0xe7   : > { %v711_v26 = vpop.f32.mrf.mxu2 }
  0xe8   : > { %v846_v27 = vpop.f32.mrf.mxu3  ;;  %v728_v28 = vadd.f32 %v711_v26, %v585_v2 }
  0xea   : > { %v863_v29 = vadd.f32 %v846_v27, %v728_v28 }
  0xeb   : > { %v3212_v30 = vpop.f32.mrf.mxu0 }
  0xec   : > { %v998_v32 = vadd.f32 %v981_v24, %v863_v29 }
  0xed   : > { %v3214_v31 = vpop.f32.mrf.mxu1 }
  0xee   : > { %v1133_v33 = vadd.f32 %v1116_v25, %v998_v32 }
  0xef   : > { %v713_v34 = vpop.f32.mrf.mxu2 }
  0xf0   : > { %v848_v35 = vpop.f32.mrf.mxu3  ;;  %v729_v17 = vadd.f32 %v713_v34, %v3208_v8 }
  0xf2   : > { %v864_v25 = vadd.f32 %v848_v35, %v729_v17 }
  0xf3   : > { %v986_v36 = vpop.f32.mrf.mxu0 }
  0xf4   : > { %v999_v34 = vadd.f32 %v3212_v30, %v864_v25 }
  0xf5   : > { %v1121_v37 = vpop.f32.mrf.mxu1 }
  0xf7   : > { %v716_v38 = vpop.f32.mrf.mxu2 }
  0xf8   : > { %v851_v39 = vpop.f32.mrf.mxu3  ;;  %v730_v40 = vadd.f32 %v716_v38, %v590_v53 }
  0xfa   : > { %v865_v41 = vadd.f32 %v851_v39, %v730_v40 }
  0xfb   : > { %v3216_v42 = vpop.f32.mrf.mxu0 }
  0xfc   : > { %v1000_v44 = vadd.f32 %v986_v36, %v865_v41 }
  0xfd   : > { %v3218_v43 = vpop.f32.mrf.mxu1 }
  0xfe   : > { %v3220_v45 = vadd.f32 %v1121_v37, %v1000_v44  ;;  %v1134_v44 = vadd.f32 %v3214_v31, %v999_v34 }
  0xff   : > { %v3222_v46 = vpop.f32.mrf.mxu2 }
 0x100   : > { %v3224_v47 = vpop.f32.mrf.mxu3 }
 0x103   : > { %v991_v48 = vpop.f32.mrf.mxu0 }
 0x105   : > { %v1126_v49 = vpop.f32.mrf.mxu1 }
 0x107   : > { %v721_v50 = vpop.f32.mrf.mxu2 }
 0x108   : > { %v856_v51 = vpop.f32.mrf.mxu3  ;;  %v732_v52 = vadd.f32 %v721_v50, %v595_v5  ;;  %v997_v5 = vadd.f32 %v978_v18, %v862_v1 }
 0x10a   : > { %v867_v54 = vadd.f32 %v856_v51, %v732_v52  ;;  %v1132_v13 = vadd.f32 %v1113_v19, %v997_v5 }
 0x10b   : > { %v3226_v55 = vpop.f32.mrf.mxu0 }
 0x10c   : > { %v1002_v57 = vadd.f32 %v991_v48, %v867_v54 }
 0x10d   : > { %v3228_v53 = vpop.f32.mrf.mxu1 }
 0x10e   : > { %v3230_v58 = vadd.f32 %v1126_v49, %v1002_v57 }
 0x10f   : > { %v3232_v60 = vpop.f32.mrf.mxu2 }
 0x110   : > { %v3234_v61 = vpop.f32.mrf.mxu3 }
 0x113   : > { %v1516_v63 = vpop.f32.mrf.mxu0 }
 0x115   : > { %v1642_v0 = vpop.f32.mrf.mxu1 }
 0x116   : > { %v1643_v18 = vadd.f32 %v3240_v10, %v1642_v0 }
 0x117   : > { %v1246_v2 = vpop.f32.mrf.mxu2 }
 0x118   : > { %v1381_v3 = vpop.f32.mrf.mxu3  ;;  %v1266_v4 = vadd.f32 %v1246_v2, %v1131_v21 }
 0x11a   : > { %v1401_v6 = vadd.f32 %v1381_v3, %v1266_v4 }
 0x11b   : > { %v1518_v7 = vpop.f32.mrf.mxu0 }
 0x11c   : > { %v1536_v12 = vadd.f32 %v1516_v63, %v1401_v6 }
 0x11d   : > { %v1644_v9 = vpop.f32.mrf.mxu1 }
 0x11e   : > { %v1548_v20 = vadd.f32 %v3245_v56, %v1536_v12  ;;  %v1645_v27 = vadd.f32 %v3240_v10, %v1644_v9 }
 0x11f   : > { %v1248_v14 = vpop.f32.mrf.mxu2 }
 0x120   : > { %v1383_v15 = vpop.f32.mrf.mxu3  ;;  %v1267_v16 = vadd.f32 %v1248_v14, %v1132_v13  ;;  %v1662_v26 = vadd.f32 %v1643_v18, %v1548_v20  ;;  %v733_v18 = vadd.f32 %v3232_v60, %v3210_v11 }
 0x122   : > { %v1402_v21 = vadd.f32 %v1383_v15, %v1267_v16  ;;  %v1670_v36 = vmax.f32 %v1662_v26, 0.0 }
 0x123   : > { %v1521_v22 = vpop.f32.mrf.mxu0 }
 0x124   : > { %v1537_v24 = vadd.f32 %v1518_v7, %v1402_v21 }
 0x125   : > { %v1647_v23 = vpop.f32.mrf.mxu1 }
 0x126   : > { %v1549_v19 = vadd.f32 %v3245_v56, %v1537_v24  ;;  %v1648_v30 = vadd.f32 %v3240_v10, %v1647_v23 }
 0x127   : > { %v1251_v28 = vpop.f32.mrf.mxu2 }
 0x128   : > { %v1386_v29 = vpop.f32.mrf.mxu3  ;;  %v1663_v8 = vadd.f32 %v1645_v27, %v1549_v19  ;;  %v1268_v32 = vadd.f32 %v1251_v28, %v1133_v33  ;;  %v731_v33 = vadd.f32 %v3222_v46, %v3201_v59 }
 0x12a   : > { %v1671_v37 = vmax.f32 %v1663_v8, 0.0  ;;  %v1403_v38 = vadd.f32 %v1386_v29, %v1268_v32  ;;  %v866_v63 = vadd.f32 %v3224_v47, %v731_v33 }
 0x12b   : > { %v1523_v39 = vpop.f32.mrf.mxu0 }
 0x12c   : > { %v2648_v41 = vpack.c.bf16 %v1671_v37, %v1670_v36  ;;  %v1538_v35 = vadd.f32 %v1521_v22, %v1403_v38  ;;  %v1001_v46 = vadd.f32 %v3216_v42, %v866_v63  ;;  %v868_v22 = vadd.f32 %v3234_v61, %v733_v18 }
 0x12d   : > { %v1649_v40 = vpop.f32.mrf.mxu1 }
 0x12e   : > { %2649 = vst [vmem:[%s3256_s15] sm:$0xff] %v2648_v41   ;;  %v1550_v51 = vadd.f32 %v3245_v56, %v1538_v35  ;;  %v1650_v31 = vadd.f32 %v3240_v10, %v1649_v40  ;;  %v1136_v14 = vadd.f32 %v3218_v43, %v1001_v46  ;;  %v1003_v28 = vadd.f32 %v3226_v55, %v868_v22 }
 0x12f   : > { %v1253_v48 = vpop.f32.mrf.mxu2 }
 0x130   : > { %v1388_v49 = vpop.f32.mrf.mxu3  ;;  %v1269_v50 = vadd.f32 %v1253_v48, %v1134_v44  ;;  %v1664_v0 = vadd.f32 %v1648_v30, %v1550_v51  ;;  %v1138_v36 = vadd.f32 %v3228_v53, %v1003_v28 }
 0x132   : > { %v1404_v52 = vadd.f32 %v1388_v49, %v1269_v50  ;;  %v1672_v5 = vmax.f32 %v1664_v0, 0.0 }
 0x133   : > { %v1526_v57 = vpop.f32.mrf.mxu0 }
 0x134   : > { %v1539_v54 = vadd.f32 %v1523_v39, %v1404_v52 }
 0x135   : > { %v1652_v62 = vpop.f32.mrf.mxu1 }
 0x136   : > { %v1551_v1 = vadd.f32 %v3245_v56, %v1539_v54 }
 0x137   : > { %v1256_v2 = vpop.f32.mrf.mxu2 }
 0x138   : > { %v1391_v3 = vpop.f32.mrf.mxu3  ;;  %v1665_v4 = vadd.f32 %v1650_v31, %v1551_v1  ;;  %v1270_v59 = vadd.f32 %v1256_v2, %v3220_v45  ;;  %v1653_v45 = vadd.f32 %v3240_v10, %v1652_v62 }
 0x13a   : > { %v1673_v6 = vmax.f32 %v1665_v4, 0.0  ;;  %v1405_v7 = vadd.f32 %v1391_v3, %v1270_v59 }
 0x13b   : > { %v1528_v13 = vpop.f32.mrf.mxu0 }
 0x13c   : > { %v2653_v9 = vpack.c.bf16 %v1673_v6, %v1672_v5  ;;  %v1540_v12 = vadd.f32 %v1526_v57, %v1405_v7 }
 0x13d   : > { %v1654_v47 = vpop.f32.mrf.mxu1 }
 0x13e   : > { %2665 = vst [vmem:[%s3256_s15 + $0x8] sm:$0xff] %v2653_v9   ;;  %v1552_v42 = vadd.f32 %v3245_v56, %v1540_v12  ;;  %v1655_v24 = vadd.f32 %v3240_v10, %v1654_v47 }
 0x13f   : > { %v1258_v15 = vpop.f32.mrf.mxu2 }
 0x140   : > { %v1393_v16 = vpop.f32.mrf.mxu3  ;;  %v1271_v17 = vadd.f32 %v1258_v15, %v1136_v14  ;;  %v1666_v23 = vadd.f32 %v1653_v45, %v1552_v42 }
 0x142   : > { %v1406_v20 = vadd.f32 %v1393_v16, %v1271_v17  ;;  %v1674_v29 = vmax.f32 %v1666_v23, 0.0 }
 0x143   : > { %v1531_v11 = vpop.f32.mrf.mxu0 }
 0x144   : > { %v1541_v21 = vadd.f32 %v1528_v13, %v1406_v20 }
 0x145   : > { %v1657_v60 = vpop.f32.mrf.mxu1 }
 0x146   : > { %v1553_v43 = vadd.f32 %v3245_v56, %v1541_v21  ;;  %v1658_v40 = vadd.f32 %v3240_v10, %v1657_v60 }
 0x147   : > { %v1261_v25 = vpop.f32.mrf.mxu2 }
 0x148   : > { %v1396_v26 = vpop.f32.mrf.mxu3  ;;  %v1667_v27 = vadd.f32 %v1655_v24, %v1553_v43  ;;  %v1272_v19 = vadd.f32 %v1261_v25, %v3230_v58 }
 0x14a   : > { %v1675_v8 = vmax.f32 %v1667_v27, 0.0  ;;  %v1407_v32 = vadd.f32 %v1396_v26, %v1272_v19 }
 0x14b   : > { %v1533_v55 = vpop.f32.mrf.mxu0 }
 0x14c   : > { %v2658_v34 = vpack.c.bf16 %v1675_v8, %v1674_v29  ;;  %v1542_v61 = vadd.f32 %v1531_v11, %v1407_v32 }
 0x14d   : > { %v1659_v35 = vpop.f32.mrf.mxu1 }
 0x14e   : > { %2666 = vst [vmem:[%s3256_s15 + $0x10] sm:$0xff] %v2658_v34   ;;  %v1554_v58 = vadd.f32 %v3245_v56, %v1542_v61  ;;  %v1660_v48 = vadd.f32 %v3240_v10, %v1659_v35 }
 0x14f   : > { %v1263_v37 = vpop.f32.mrf.mxu2 }
 0x150   : > { %v1273_v38 = vadd.f32 %v1263_v37, %v1138_v36  ;;  %v1398_v39 = vpop.f32.mrf.mxu3  ;;  %v1668_v53 = vadd.f32 %v1658_v40, %v1554_v58 }
 0x152   : > { %v1408_v41 = vadd.f32 %v1398_v39, %v1273_v38  ;;  %v1676_v33 = vmax.f32 %v1668_v53, 0.0 }
 0x154   : > { %v1543_v44 = vadd.f32 %v1533_v55, %v1408_v41 }
 0x156   : > { %v1555_v49 = vadd.f32 %v3245_v56, %v1543_v44 }
 0x158   : > { %v1669_v50 = vadd.f32 %v1660_v48, %v1555_v49 }
 0x15a   : > { %v1677_v30 = vmax.f32 %v1669_v50, 0.0 }
 0x15c   : > { %v2663_v51 = vpack.c.bf16 %v1677_v30, %v1676_v33 }
 0x15e   : > { %2667 = vst [vmem:[%s3256_s15 + $0x18] sm:$0xff] %v2663_v51  }
 0x15f   : > { %2771 = shalt.err (!%p2768_p5)
}
 0x160   : > { %s2824_s13 = smov 64   ;;  %s2825_s15 = smov 4  }
 0x161   : > { %2685 = dma.vmem_to_hbm [thread:$0]  (%p2901_p4), %s1709_s28, 512, %s1711_s30, %s1695_s24, %s2824_s13, %s2824_s13, %s2825_s15  }
 0x162 PF: > { %p2691_p6 = scmp.ge.s32.totalorder %s2822_s26, 2  ;;  %s1725_s17 = sand.u32 1, %s2802_s21  }
 0x163   : > { %s1726_s18 = scalar_lea.sflag [#allocation3], %s1725_s17 }
 0x164   : > { %p2688_p7 = pnand %p2691_p6, %p2908_p8 }
 0x166   : > { %p2689_p9 = pneg %p2688_p7 }
 0x168   : > { %2797 = dma.done.wait (%p2689_p9), %s1726_s18, 512  }
 0x169   : > { %2799 = vsyncadd (%p2689_p9), %s1726_s18, 4294966784  ;;  %s19_s26 = sadd.s32 1, %s2822_s26   ;;  %s3335_s21 = smov %s2806_s22 }
 0x16a   : > { %p16_p10 = scmp.ge.s32.totalorder %s19_s26, 4   ;;  %s3336_s22 = smov %s2810_s23 }
 0x16b   : > { %s3337_s23 = smov %s2914_s10  ;;  %s3338_s24 = smov %s2818_s25 }
 0x16c   : > { %s3339_s25 = smov %s3341_s29  ;;  %18 = sbr.rel (!%p16_p10) target bundleno = 4 (0x4), region = 110 }
 0x171   :  { %1732 = vsyncpa [#allocation3], 1 }
 0x172   :  { %1734 = vsyncpa [#allocation3 + $0x1], 1 }

</bundles_post_ra>
